<compile_context>
chip_gen: v7x
topology: tpu7x:2x2x1
jax: 0.10.0
libtpu: 0.0.40
codegen_flags: <defaults>
</compile_context>

<pallas_src>
import functools

import numpy as np

import jax
import jax.numpy as jnp
from jax.experimental import pallas as pl
from jax.experimental.pallas import tpu as pltpu

_VMEM_LIMIT = 32 * 1024 * 1024  # safe on v5e/v6e/v7x; blocks here are far smaller


# --------------------------------------------------------------------------------------
# Selection matrices (built once at trace time; tiny, static 0/1 matrices)
# --------------------------------------------------------------------------------------
def _dw_w_selection(k, stride, pad, W, Wo, dtype=jnp.float32):
    # sel[kw*Wo + wo, w] == 1  iff  w == stride*wo + kw - pad  and it is a valid (non-pad)
    # column.  Out-of-range (zero-padding) taps become all-zero rows -> contribute 0.
    m = np.zeros((k * Wo, W), np.float32)
    for kw in range(k):
        for wo in range(Wo):
            w = stride * wo + kw - pad
            if 0 <= w < W:
                m[kw * Wo + wo, w] = 1.0
    return jnp.asarray(m, dtype)


def _downsample_selection(stride, H, W, Ho, Wo, dtype=jnp.float32):
    # sel[ho*Wo + wo, h*W + w] == 1  iff  (h, w) == (stride*ho, stride*wo)
    m = np.zeros((Ho * Wo, H * W), np.float32)
    for ho in range(Ho):
        for wo in range(Wo):
            m[ho * Wo + wo, (stride * ho) * W + stride * wo] = 1.0
    return jnp.asarray(m, dtype)


# --------------------------------------------------------------------------------------
# Kernel A: fused 1x1 expand + BN + ReLU + depthwise kxk (stride s) + BN + ReLU + SE pool
# --------------------------------------------------------------------------------------
def _expand_dw_se_kernel(x_ref, w1_ref, s1_ref, b1_ref, sw_ref, wdw_ref, s2_ref, b2_ref,
                         y_ref, pool_ref, *, H, W, Ho, Wo, ksize, stride, pad):
    # x_ref: (1, H*W, Cin) one image, pixels as rows.
    xv = x_ref[0]                                                         # (H*W, Cin)
    y2 = jnp.dot(xv, w1_ref[...], preferred_element_type=jnp.float32)     # (H*W, E)
    y2 = jnp.maximum(y2 * s1_ref[...] + b1_ref[...], 0.0)                 # expand+BN+ReLU

    sw = sw_ref[...]                                                      # (k*Wo, W)
    wdw = wdw_ref[...]                                                    # (k*k, E)
    s2 = s2_ref[...]                                                      # (1, E)
    b2 = b2_ref[...]                                                      # (1, E)
    E = wdw.shape[1]

    se_sum = jnp.zeros((1, E), jnp.float32)
    for ho in range(Ho):                                     # static unroll (small Ho)
        acc = jnp.zeros((Wo, E), jnp.float32)
        for kh in range(ksize):
            r = stride * ho + kh - pad                       # source row (static)
            if 0 <= r < H:                                   # zero-pad rows skipped statically
                row = y2[r * W:(r + 1) * W, :]               # (W, E) aligned static slice
                # all k W-taps (with stride + zero-pad) in one small MXU matmul
                prod = jnp.dot(sw, row, preferred_element_type=jnp.float32)   # (k*Wo, E)
                for kw in range(ksize):
                    acc = acc + prod[kw * Wo:(kw + 1) * Wo, :] * wdw[kh * ksize + kw]
        yrow = jnp.maximum(acc * s2 + b2, 0.0)               # depthwise BN + ReLU
        y_ref[0, ho * Wo:(ho + 1) * Wo, :] = yrow.astype(y_ref.dtype)
        se_sum = se_sum + jnp.sum(yrow, axis=0, keepdims=True)

    pool_ref[0] = (se_sum * (1.0 / float(Ho * Wo))).astype(pool_ref.dtype)


def expand_dw_se(x_flat, w1, s1, b1, sw, wdw_flat, s2, b2, *, H, W, Ho, Wo, ksize, stride, pad):
    N, HW, Cin = x_flat.shape
    E = w1.shape[1]
    P = Ho * Wo
    kern = functools.partial(_expand_dw_se_kernel, H=H, W=W, Ho=Ho, Wo=Wo,
                             ksize=ksize, stride=stride, pad=pad)
    return pl.pallas_call(
        kern,
        out_shape=(jax.ShapeDtypeStruct((N, P, E), x_flat.dtype),
                   jax.ShapeDtypeStruct((N, 1, E), jnp.float32)),
        grid=(N,),
        in_specs=[
            pl.BlockSpec((1, HW, Cin), lambda n: (n, 0, 0)),
            pl.BlockSpec((Cin, E), lambda n: (0, 0)),
            pl.BlockSpec((1, E), lambda n: (0, 0)),
            pl.BlockSpec((1, E), lambda n: (0, 0)),
            pl.BlockSpec((ksize * Wo, W), lambda n: (0, 0)),
            pl.BlockSpec((ksize * ksize, E), lambda n: (0, 0)),
            pl.BlockSpec((1, E), lambda n: (0, 0)),
            pl.BlockSpec((1, E), lambda n: (0, 0)),
        ],
        out_specs=(pl.BlockSpec((1, P, E), lambda n: (n, 0, 0)),
                   pl.BlockSpec((1, 1, E), lambda n: (n, 0, 0))),
        compiler_params=pltpu.CompilerParams(
            dimension_semantics=("parallel",),
            vmem_limit_bytes=_VMEM_LIMIT),
    )(x_flat, w1, s1, b1, sw, wdw_flat, s2, b2)


# --------------------------------------------------------------------------------------
# Kernel B: fused SE-gate + 1x1 project + BN + ReLU + residual (downsample conv fused in)
# Output is produced transposed, as (Cout, Ho*Wo): lane-dense store, no final transpose.
# --------------------------------------------------------------------------------------
def _proj_res_ds_kernel(y_ref, g_ref, w3t_ref, s3_ref, b3_ref,
                        x_ref, sd_ref, wdt_ref, sdd_ref, bdd_ref, o_ref):
    # SE gate applied to the rows BEFORE the matmul (per-image, per-channel scale).
    yv = y_ref[0].astype(jnp.float32) * g_ref[0]                           # (P, E)
    # Projection, computed already transposed: out[c, p] = sum_e w3t[c, e] * yv[p, e]
    proj = jax.lax.dot_general(w3t_ref[...], yv, (((1,), (1,)), ((), ())),
                               preferred_element_type=jnp.float32)         # (Cout, P)
    proj = jnp.maximum(proj * s3_ref[...] + b3_ref[...], 0.0)              # BN + ReLU
    # Residual: strided 1x1 downsample conv + BN, via selection matmul (no strided loads).
    xsel = jax.lax.dot_general(x_ref[0].astype(jnp.float32), sd_ref[...],
                               (((1,), (1,)), ((), ())),
                               preferred_element_type=jnp.float32)         # (Cin, P)
    res = jnp.dot(wdt_ref[...], xsel, preferred_element_type=jnp.float32)  # (Cout, P)
    res = res * sdd_ref[...] + bdd_ref[...]
    o_ref[0] = (proj + res).astype(o_ref.dtype)


def _proj_res_id_kernel(y_ref, g_ref, w3t_ref, s3_ref, b3_ref, r_ref, o_ref):
    yv = y_ref[0].astype(jnp.float32) * g_ref[0]
    proj = jax.lax.dot_general(w3t_ref[...], yv, (((1,), (1,)), ((), ())),
                               preferred_element_type=jnp.float32)
    proj = jnp.maximum(proj * s3_ref[...] + b3_ref[...], 0.0)
    o_ref[0] = (proj + r_ref[0].astype(jnp.float32)).astype(o_ref.dtype)


def proj_residual_downsample(y, gate, w3t, s3, b3, x_chw, sd, wdt, sdd, bdd):
    N, P, E = y.shape
    Cout = w3t.shape[0]
    Cin, HW = x_chw.shape[1], x_chw.shape[2]
    return pl.pallas_call(
        _proj_res_ds_kernel,
        out_shape=jax.ShapeDtypeStruct((N, Cout, P), y.dtype),
        grid=(N,),
        in_specs=[
            pl.BlockSpec((1, P, E), lambda n: (n, 0, 0)),
            pl.BlockSpec((1, 1, E), lambda n: (n, 0, 0)),
            pl.BlockSpec((Cout, E), lambda n: (0, 0)),
            pl.BlockSpec((Cout, 1), lambda n: (0, 0)),
            pl.BlockSpec((Cout, 1), lambda n: (0, 0)),
            pl.BlockSpec((1, Cin, HW), lambda n: (n, 0, 0)),
            pl.BlockSpec((P, HW), lambda n: (0, 0)),
            pl.BlockSpec((Cout, Cin), lambda n: (0, 0)),
            pl.BlockSpec((Cout, 1), lambda n: (0, 0)),
            pl.BlockSpec((Cout, 1), lambda n: (0, 0)),
        ],
        out_specs=pl.BlockSpec((1, Cout, P), lambda n: (n, 0, 0)),
        compiler_params=pltpu.CompilerParams(
            dimension_semantics=("parallel",),
            vmem_limit_bytes=_VMEM_LIMIT),
    )(y, gate, w3t, s3, b3, x_chw, sd, wdt, sdd, bdd)


def proj_residual_identity(y, gate, w3t, s3, b3, res_chw):
    N, P, E = y.shape
    Cout = w3t.shape[0]
    return pl.pallas_call(
        _proj_res_id_kernel,
        out_shape=jax.ShapeDtypeStruct((N, Cout, P), y.dtype),
        grid=(N,),
        in_specs=[
            pl.BlockSpec((1, P, E), lambda n: (n, 0, 0)),
            pl.BlockSpec((1, 1, E), lambda n: (n, 0, 0)),
            pl.BlockSpec((Cout, E), lambda n: (0, 0)),
            pl.BlockSpec((Cout, 1), lambda n: (0, 0)),
            pl.BlockSpec((Cout, 1), lambda n: (0, 0)),
            pl.BlockSpec((1, Cout, P), lambda n: (n, 0, 0)),
        ],
        out_specs=pl.BlockSpec((1, Cout, P), lambda n: (n, 0, 0)),
        compiler_params=pltpu.CompilerParams(
            dimension_semantics=("parallel",),
            vmem_limit_bytes=_VMEM_LIMIT),
    )(y, gate, w3t, s3, b3, res_chw)


# --------------------------------------------------------------------------------------
# Bottleneck forward (NCHW in / NCHW out, like the PyTorch module)
# --------------------------------------------------------------------------------------
def bottleneck_forward(x_nchw, p, ksize, stride):
    N, Cin, H, W = x_nchw.shape
    E = p["w1"].shape[1]
    Cout = p["w3"].shape[1]
    pad = ksize // 2
    Ho = (H + 2 * pad - ksize) // stride + 1
    Wo = (W + 2 * pad - ksize) // stride + 1
    HW, P = H * W, Ho * Wo

    # layouts (cheap reshapes/transpose of the small input tensor only)
    x_chw = x_nchw.reshape(N, Cin, HW)                               # residual path (no transpose)
    x_rows = jnp.transpose(x_nchw, (0, 2, 3, 1)).reshape(N, HW, Cin) # pixels-as-rows for expand

    sw = _dw_w_selection(ksize, stride, pad, W, Wo)

    # ---- Kernel A: expand + depthwise(+stride) + SE pooling, fused, grid over batch ----
    y_dw, pooled = expand_dw_se(
        x_rows, p["w1"], p["s1"].reshape(1, E), p["b1"].reshape(1, E),
        sw, p["wdw"].reshape(ksize * ksize, E),
        p["s2"].reshape(1, E), p["b2"].reshape(1, E),
        H=H, W=W, Ho=Ho, Wo=Wo, ksize=ksize, stride=stride, pad=pad)

    # ---- SE bottleneck FCs + hard-sigmoid (tiny (N,E) tensors -> plain JAX) ----
    pooled2 = pooled.reshape(N, E)
    z = jnp.maximum(pooled2 @ p["se_w1"] + p["se_b1"], 0.0)
    gate = jnp.clip((z @ p["se_w2"] + p["se_b2"]) / 6.0 + 0.5, 0.0, 1.0).reshape(N, 1, E)

    # ---- Kernel B: gate + project + BN + ReLU + residual, transposed (Cout, P) output ----
    w3t = jnp.transpose(p["w3"])                  # (Cout, E)
    s3 = p["s3"].reshape(Cout, 1)
    b3 = p["b3"].reshape(Cout, 1)
    if Cin == Cout and stride == 1:
        out = proj_residual_identity(y_dw, gate, w3t, s3, b3, x_chw)
    else:
        sd_sel = _downsample_selection(stride, H, W, Ho, Wo)
        out = proj_residual_downsample(
            y_dw, gate, w3t, s3, b3, x_chw, sd_sel,
            jnp.transpose(p["wd"]), p["sd"].reshape(Cout, 1), p["bd"].reshape(Cout, 1))

    return out.reshape(N, Cout, Ho, Wo)           # already channel-major: pure reshape


# --------------------------------------------------------------------------------------
# Pure-JAX reference (for correctness check)
# --------------------------------------------------------------------------------------
def ref_bottleneck(x_nchw, p, k, stride):
    x = jnp.transpose(x_nchw, (0, 2, 3, 1)).astype(jnp.float32)
    N, H, W, Cin = x.shape
    Cout = p["w3"].shape[1]
    y = jnp.maximum(jnp.einsum("nhwc,ce->nhwe", x, p["w1"]) * p["s1"] + p["b1"], 0.0)
    pad = k // 2
    yp = jnp.pad(y, ((0, 0), (pad, pad), (pad, pad), (0, 0)))
    Ho = (H + 2 * pad - k) // stride + 1
    Wo = (W + 2 * pad - k) // stride + 1
    acc = jnp.zeros((N, Ho, Wo, y.shape[-1]), jnp.float32)
    for kh in range(k):
        for kw in range(k):
            patch = yp[:, kh:kh + (Ho - 1) * stride + 1:stride,
                       kw:kw + (Wo - 1) * stride + 1:stride, :]
            acc = acc + patch * p["wdw"][kh, kw]
    y = jnp.maximum(acc * p["s2"] + p["b2"], 0.0)
    pooled = jnp.mean(y, axis=(1, 2))
    z = jnp.maximum(pooled @ p["se_w1"] + p["se_b1"], 0.0)
    g = jnp.clip((z @ p["se_w2"] + p["se_b2"]) / 6.0 + 0.5, 0.0, 1.0)
    y = y * g[:, None, None, :]
    out = jnp.maximum(jnp.einsum("nhwe,eo->nhwo", y, p["w3"]) * p["s3"] + p["b3"], 0.0)
    if Cin == Cout and stride == 1:
        res = x
    else:
        xs = x[:, ::stride, ::stride, :]
        res = jnp.einsum("nhwc,co->nhwo", xs, p["wd"]) * p["sd"] + p["bd"]
    return jnp.transpose(out + res, (0, 3, 1, 2))


# --------------------------------------------------------------------------------------
# Deterministic parameter init (folding BatchNorm into scale/bias, eval semantics)
# --------------------------------------------------------------------------------------
def _fold_bn(gamma, beta, mean, var, eps=1e-5):
    scale = gamma / jnp.sqrt(var + eps)
    bias = beta - mean * scale
    return scale, bias


def init_params(key, c_in, kernel, expansion, c_out):
    ks = jax.random.split(key, 16)
    er = max(expansion // 4, 1)

    def nrm(k, shape, s=0.1):
        return (s * jax.random.normal(k, shape)).astype(jnp.float32)

    def bn(k, c):
        k1, k2, k3, k4 = jax.random.split(k, 4)
        gamma = 1.0 + nrm(k1, (c,))
        beta = nrm(k2, (c,))
        mean = nrm(k3, (c,))
        var = 1.0 + jnp.abs(nrm(k4, (c,)))
        return _fold_bn(gamma, beta, mean, var)

    s1, b1 = bn(ks[1], expansion)
    s2, b2 = bn(ks[3], expansion)
    s3, b3 = bn(ks[5], c_out)
    sd, bd = bn(ks[7], c_out)
    return dict(
        w1=nrm(ks[0], (c_in, expansion)), s1=s1, b1=b1,
        wdw=nrm(ks[2], (kernel, kernel, expansion)), s2=s2, b2=b2,
        se_w1=nrm(ks[8], (expansion, er)), se_b1=nrm(ks[9], (er,)),
        se_w2=nrm(ks[10], (er, expansion)), se_b2=nrm(ks[11], (expansion,)),
        w3=nrm(ks[4], (expansion, c_out)), s3=s3, b3=b3,
        wd=nrm(ks[6], (c_in, c_out)), sd=sd, bd=bd,
    )


if __name__ == "__main__":
    # Bottleneck(input_channels=4, kernel=3, stride=2, expansion=32, output_channels=8,
    #            activation=nn.ReLU())
    N, C_IN, H, W = 2, 4, 16, 16
    KERNEL, STRIDE, EXPANSION, C_OUT = 3, 2, 32, 8

    key = jax.random.PRNGKey(0)
    kx, kp = jax.random.split(key)
    x = jax.random.normal(kx, (N, C_IN, H, W), dtype=jnp.float32)   # NCHW, like PyTorch
    params = init_params(kp, C_IN, KERNEL, EXPANSION, C_OUT)

    out = bottleneck_forward(x, params, KERNEL, STRIDE)
    out = jax.block_until_ready(out)

    ref = jax.block_until_ready(ref_bottleneck(x, params, KERNEL, STRIDE))
    assert out.shape == ref.shape, (out.shape, ref.shape)
    assert jnp.allclose(out, ref, rtol=1e-4, atol=1e-4), float(jnp.max(jnp.abs(out - ref)))

    print("KERNEL_OK")
</pallas_src>

<mosaic_0001>
module attributes {stable_mosaic.version = 11 : i64} {
  func.func @_expand_dw_se_kernel(%arg0: i32, %arg1: memref<1x256x4xf32, #tpu.memory_space<vmem>>, %arg2: memref<4x32xf32, #tpu.memory_space<vmem>>, %arg3: memref<1x32xf32, #tpu.memory_space<vmem>>, %arg4: memref<1x32xf32, #tpu.memory_space<vmem>>, %arg5: memref<24x16xf32, #tpu.memory_space<vmem>>, %arg6: memref<9x32xf32, #tpu.memory_space<vmem>>, %arg7: memref<1x32xf32, #tpu.memory_space<vmem>>, %arg8: memref<1x32xf32, #tpu.memory_space<vmem>>, %arg9: memref<1x64x32xf32, #tpu.memory_space<vmem>>, %arg10: memref<1x1x32xf32, #tpu.memory_space<vmem>>) attributes {dimension_semantics = [#tpu.dimension_semantics<parallel>], iteration_bounds = array<i64: 2>, scalar_prefetch = 0 : i64, scratch_operands = 0 : i64, tpu.core_type = #tpu.core_type<tc>, window_params = [{transform_indices = @transform_0, window_bounds = array<i64: 1, 256, 4>}, {pipeline_mode = #tpu.pipeline_mode<synchronous>, transform_indices = @transform_1, window_bounds = array<i64: 4, 32>}, {pipeline_mode = #tpu.pipeline_mode<synchronous>, transform_indices = @transform_2, window_bounds = array<i64: 1, 32>}, {pipeline_mode = #tpu.pipeline_mode<synchronous>, transform_indices = @transform_3, window_bounds = array<i64: 1, 32>}, {pipeline_mode = #tpu.pipeline_mode<synchronous>, transform_indices = @transform_4, window_bounds = array<i64: 24, 16>}, {pipeline_mode = #tpu.pipeline_mode<synchronous>, transform_indices = @transform_5, window_bounds = array<i64: 9, 32>}, {pipeline_mode = #tpu.pipeline_mode<synchronous>, transform_indices = @transform_6, window_bounds = array<i64: 1, 32>}, {pipeline_mode = #tpu.pipeline_mode<synchronous>, transform_indices = @transform_7, window_bounds = array<i64: 1, 32>}, {transform_indices = @transform_8, window_bounds = array<i64: 1, 64, 32>}, {transform_indices = @transform_9, window_bounds = array<i64: 1, 1, 32>}]} {
    %c0 = arith.constant 0 : index
    %c0_0 = arith.constant 0 : index
    %c0_1 = arith.constant 0 : index
    %0 = vector.load %arg1[%c0, %c0_0, %c0_1] : memref<1x256x4xf32, #tpu.memory_space<vmem>>, vector<1x256x4xf32>
    %1 = vector.shape_cast %0 : vector<1x256x4xf32> to vector<256x4xf32>
    %c0_2 = arith.constant 0 : index
    %c0_3 = arith.constant 0 : index
    %2 = vector.load %arg2[%c0_2, %c0_3] : memref<4x32xf32, #tpu.memory_space<vmem>>, vector<4x32xf32>
    %cst = arith.constant dense<0.000000e+00> : vector<256x32xf32>
    %3 = tpu.matmul %1, %2, %cst {dimension_numbers = #tpu.dot_dimension_numbers<[1], [0], [0], [1], [0, 0, 1, 1], [], []>} : vector<256x4xf32>, vector<4x32xf32>, vector<256x32xf32> -> vector<256x32xf32>
    %c0_4 = arith.constant 0 : index
    %c0_5 = arith.constant 0 : index
    %4 = vector.load %arg3[%c0_4, %c0_5] : memref<1x32xf32, #tpu.memory_space<vmem>>, vector<1x32xf32>
    %5 = vector.broadcast %4 : vector<1x32xf32> to vector<256x32xf32>
    %6 = arith.mulf %3, %5 : vector<256x32xf32>
    %c0_6 = arith.constant 0 : index
    %c0_7 = arith.constant 0 : index
    %7 = vector.load %arg4[%c0_6, %c0_7] : memref<1x32xf32, #tpu.memory_space<vmem>>, vector<1x32xf32>
    %8 = vector.broadcast %7 : vector<1x32xf32> to vector<256x32xf32>
    %9 = arith.addf %6, %8 : vector<256x32xf32>
    %cst_8 = arith.constant 0.000000e+00 : f32
    %10 = vector.broadcast %cst_8 : f32 to vector<256x32xf32>
    %11 = arith.maximumf %9, %10 : vector<256x32xf32>
    %c0_9 = arith.constant 0 : index
    %c0_10 = arith.constant 0 : index
    %12 = vector.load %arg5[%c0_9, %c0_10] : memref<24x16xf32, #tpu.memory_space<vmem>>, vector<24x16xf32>
    %c0_11 = arith.constant 0 : index
    %c0_12 = arith.constant 0 : index
    %13 = vector.load %arg6[%c0_11, %c0_12] : memref<9x32xf32, #tpu.memory_space<vmem>>, vector<9x32xf32>
    %c0_13 = arith.constant 0 : index
    %c0_14 = arith.constant 0 : index
    %14 = vector.load %arg7[%c0_13, %c0_14] : memref<1x32xf32, #tpu.memory_space<vmem>>, vector<1x32xf32>
    %c0_15 = arith.constant 0 : index
    %c0_16 = arith.constant 0 : index
    %15 = vector.load %arg8[%c0_15, %c0_16] : memref<1x32xf32, #tpu.memory_space<vmem>>, vector<1x32xf32>
    %cst_17 = arith.constant 0.000000e+00 : f32
    %16 = vector.broadcast %cst_17 : f32 to vector<1x32xf32>
    %cst_18 = arith.constant 0.000000e+00 : f32
    %17 = vector.broadcast %cst_18 : f32 to vector<8x32xf32>
    %18 = vector.extract_strided_slice %11 {offsets = [0, 0], sizes = [16, 32], strides = [1, 1]} : vector<256x32xf32> to vector<16x32xf32>
    %cst_19 = arith.constant dense<0.000000e+00> : vector<24x32xf32>
    %19 = tpu.matmul %12, %18, %cst_19 {dimension_numbers = #tpu.dot_dimension_numbers<[1], [0], [0], [1], [0, 0, 1, 1], [], []>} : vector<24x16xf32>, vector<16x32xf32>, vector<24x32xf32> -> vector<24x32xf32>
    %20 = vector.extract_strided_slice %19 {offsets = [0, 0], sizes = [8, 32], strides = [1, 1]} : vector<24x32xf32> to vector<8x32xf32>
    %21 = vector.extract_strided_slice %13 {offsets = [3, 0], sizes = [1, 32], strides = [1, 1]} : vector<9x32xf32> to vector<1x32xf32>
    %22 = vector.shape_cast %21 : vector<1x32xf32> to vector<32xf32>
    %23 = vector.shape_cast %22 : vector<32xf32> to vector<1x32xf32>
    %24 = vector.broadcast %23 : vector<1x32xf32> to vector<8x32xf32>
    %25 = arith.mulf %20, %24 : vector<8x32xf32>
    %26 = arith.addf %17, %25 : vector<8x32xf32>
    %27 = vector.extract_strided_slice %19 {offsets = [8, 0], sizes = [8, 32], strides = [1, 1]} : vector<24x32xf32> to vector<8x32xf32>
    %28 = vector.extract_strided_slice %13 {offsets = [4, 0], sizes = [1, 32], strides = [1, 1]} : vector<9x32xf32> to vector<1x32xf32>
    %29 = vector.shape_cast %28 : vector<1x32xf32> to vector<32xf32>
    %30 = vector.shape_cast %29 : vector<32xf32> to vector<1x32xf32>
    %31 = vector.broadcast %30 : vector<1x32xf32> to vector<8x32xf32>
    %32 = arith.mulf %27, %31 : vector<8x32xf32>
    %33 = arith.addf %26, %32 : vector<8x32xf32>
    %34 = vector.extract_strided_slice %19 {offsets = [16, 0], sizes = [8, 32], strides = [1, 1]} : vector<24x32xf32> to vector<8x32xf32>
    %35 = vector.extract_strided_slice %13 {offsets = [5, 0], sizes = [1, 32], strides = [1, 1]} : vector<9x32xf32> to vector<1x32xf32>
    %36 = vector.shape_cast %35 : vector<1x32xf32> to vector<32xf32>
    %37 = vector.shape_cast %36 : vector<32xf32> to vector<1x32xf32>
    %38 = vector.broadcast %37 : vector<1x32xf32> to vector<8x32xf32>
    %39 = arith.mulf %34, %38 : vector<8x32xf32>
    %40 = arith.addf %33, %39 : vector<8x32xf32>
    %41 = vector.extract_strided_slice %11 {offsets = [16, 0], sizes = [16, 32], strides = [1, 1]} : vector<256x32xf32> to vector<16x32xf32>
    %cst_20 = arith.constant dense<0.000000e+00> : vector<24x32xf32>
    %42 = tpu.matmul %12, %41, %cst_20 {dimension_numbers = #tpu.dot_dimension_numbers<[1], [0], [0], [1], [0, 0, 1, 1], [], []>} : vector<24x16xf32>, vector<16x32xf32>, vector<24x32xf32> -> vector<24x32xf32>
    %43 = vector.extract_strided_slice %42 {offsets = [0, 0], sizes = [8, 32], strides = [1, 1]} : vector<24x32xf32> to vector<8x32xf32>
    %44 = vector.extract_strided_slice %13 {offsets = [6, 0], sizes = [1, 32], strides = [1, 1]} : vector<9x32xf32> to vector<1x32xf32>
    %45 = vector.shape_cast %44 : vector<1x32xf32> to vector<32xf32>
    %46 = vector.shape_cast %45 : vector<32xf32> to vector<1x32xf32>
    %47 = vector.broadcast %46 : vector<1x32xf32> to vector<8x32xf32>
    %48 = arith.mulf %43, %47 : vector<8x32xf32>
    %49 = arith.addf %40, %48 : vector<8x32xf32>
    %50 = vector.extract_strided_slice %42 {offsets = [8, 0], sizes = [8, 32], strides = [1, 1]} : vector<24x32xf32> to vector<8x32xf32>
    %51 = vector.extract_strided_slice %13 {offsets = [7, 0], sizes = [1, 32], strides = [1, 1]} : vector<9x32xf32> to vector<1x32xf32>
    %52 = vector.shape_cast %51 : vector<1x32xf32> to vector<32xf32>
    %53 = vector.shape_cast %52 : vector<32xf32> to vector<1x32xf32>
    %54 = vector.broadcast %53 : vector<1x32xf32> to vector<8x32xf32>
    %55 = arith.mulf %50, %54 : vector<8x32xf32>
    %56 = arith.addf %49, %55 : vector<8x32xf32>
    %57 = vector.extract_strided_slice %42 {offsets = [16, 0], sizes = [8, 32], strides = [1, 1]} : vector<24x32xf32> to vector<8x32xf32>
    %58 = vector.extract_strided_slice %13 {offsets = [8, 0], sizes = [1, 32], strides = [1, 1]} : vector<9x32xf32> to vector<1x32xf32>
    %59 = vector.shape_cast %58 : vector<1x32xf32> to vector<32xf32>
    %60 = vector.shape_cast %59 : vector<32xf32> to vector<1x32xf32>
    %61 = vector.broadcast %60 : vector<1x32xf32> to vector<8x32xf32>
    %62 = arith.mulf %57, %61 : vector<8x32xf32>
    %63 = arith.addf %56, %62 : vector<8x32xf32>
    %64 = vector.broadcast %14 : vector<1x32xf32> to vector<8x32xf32>
    %65 = arith.mulf %63, %64 : vector<8x32xf32>
    %66 = vector.broadcast %15 : vector<1x32xf32> to vector<8x32xf32>
    %67 = arith.addf %65, %66 : vector<8x32xf32>
    %cst_21 = arith.constant 0.000000e+00 : f32
    %68 = vector.broadcast %cst_21 : f32 to vector<8x32xf32>
    %69 = arith.maximumf %67, %68 : vector<8x32xf32>
    %c0_22 = arith.constant 0 : index
    %c0_23 = arith.constant 0 : index
    %c0_24 = arith.constant 0 : index
    %70 = vector.load %arg9[%c0_22, %c0_23, %c0_24] : memref<1x64x32xf32, #tpu.memory_space<vmem>>, vector<1x8x32xf32>
    %71 = vector.shape_cast %70 : vector<1x8x32xf32> to vector<8x32xf32>
    %72 = vector.shape_cast %69 : vector<8x32xf32> to vector<1x8x32xf32>
    tpu.vector_store %arg9[%c0_22, %c0_23, %c0_24], %72 {strides = array<i32>} : memref<1x64x32xf32, #tpu.memory_space<vmem>>, vector<1x8x32xf32>,
    %cst_25 = arith.constant dense<0.000000e+00> : vector<32xf32>
    %73 = vector.multi_reduction <add>, %69, %cst_25 [0] : vector<8x32xf32> to vector<32xf32>
    %74 = vector.shape_cast %73 : vector<32xf32> to vector<1x32xf32>
    %75 = arith.addf %16, %74 : vector<1x32xf32>
    %cst_26 = arith.constant 0.000000e+00 : f32
    %76 = vector.broadcast %cst_26 : f32 to vector<8x32xf32>
    %77 = vector.extract_strided_slice %11 {offsets = [16, 0], sizes = [16, 32], strides = [1, 1]} : vector<256x32xf32> to vector<16x32xf32>
    %cst_27 = arith.constant dense<0.000000e+00> : vector<24x32xf32>
    %78 = tpu.matmul %12, %77, %cst_27 {dimension_numbers = #tpu.dot_dimension_numbers<[1], [0], [0], [1], [0, 0, 1, 1], [], []>} : vector<24x16xf32>, vector<16x32xf32>, vector<24x32xf32> -> vector<24x32xf32>
    %79 = vector.extract_strided_slice %78 {offsets = [0, 0], sizes = [8, 32], strides = [1, 1]} : vector<24x32xf32> to vector<8x32xf32>
    %80 = vector.extract_strided_slice %13 {offsets = [0, 0], sizes = [1, 32], strides = [1, 1]} : vector<9x32xf32> to vector<1x32xf32>
    %81 = vector.shape_cast %80 : vector<1x32xf32> to vector<32xf32>
    %82 = vector.shape_cast %81 : vector<32xf32> to vector<1x32xf32>
    %83 = vector.broadcast %82 : vector<1x32xf32> to vector<8x32xf32>
    %84 = arith.mulf %79, %83 : vector<8x32xf32>
    %85 = arith.addf %76, %84 : vector<8x32xf32>
    %86 = vector.extract_strided_slice %78 {offsets = [8, 0], sizes = [8, 32], strides = [1, 1]} : vector<24x32xf32> to vector<8x32xf32>
    %87 = vector.extract_strided_slice %13 {offsets = [1, 0], sizes = [1, 32], strides = [1, 1]} : vector<9x32xf32> to vector<1x32xf32>
    %88 = vector.shape_cast %87 : vector<1x32xf32> to vector<32xf32>
    %89 = vector.shape_cast %88 : vector<32xf32> to vector<1x32xf32>
    %90 = vector.broadcast %89 : vector<1x32xf32> to vector<8x32xf32>
    %91 = arith.mulf %86, %90 : vector<8x32xf32>
    %92 = arith.addf %85, %91 : vector<8x32xf32>
    %93 = vector.extract_strided_slice %78 {offsets = [16, 0], sizes = [8, 32], strides = [1, 1]} : vector<24x32xf32> to vector<8x32xf32>
    %94 = vector.extract_strided_slice %13 {offsets = [2, 0], sizes = [1, 32], strides = [1, 1]} : vector<9x32xf32> to vector<1x32xf32>
    %95 = vector.shape_cast %94 : vector<1x32xf32> to vector<32xf32>
    %96 = vector.shape_cast %95 : vector<32xf32> to vector<1x32xf32>
    %97 = vector.broadcast %96 : vector<1x32xf32> to vector<8x32xf32>
    %98 = arith.mulf %93, %97 : vector<8x32xf32>
    %99 = arith.addf %92, %98 : vector<8x32xf32>
    %100 = vector.extract_strided_slice %11 {offsets = [32, 0], sizes = [16, 32], strides = [1, 1]} : vector<256x32xf32> to vector<16x32xf32>
    %cst_28 = arith.constant dense<0.000000e+00> : vector<24x32xf32>
    %101 = tpu.matmul %12, %100, %cst_28 {dimension_numbers = #tpu.dot_dimension_numbers<[1], [0], [0], [1], [0, 0, 1, 1], [], []>} : vector<24x16xf32>, vector<16x32xf32>, vector<24x32xf32> -> vector<24x32xf32>
    %102 = vector.extract_strided_slice %101 {offsets = [0, 0], sizes = [8, 32], strides = [1, 1]} : vector<24x32xf32> to vector<8x32xf32>
    %103 = vector.extract_strided_slice %13 {offsets = [3, 0], sizes = [1, 32], strides = [1, 1]} : vector<9x32xf32> to vector<1x32xf32>
    %104 = vector.shape_cast %103 : vector<1x32xf32> to vector<32xf32>
    %105 = vector.shape_cast %104 : vector<32xf32> to vector<1x32xf32>
    %106 = vector.broadcast %105 : vector<1x32xf32> to vector<8x32xf32>
    %107 = arith.mulf %102, %106 : vector<8x32xf32>
    %108 = arith.addf %99, %107 : vector<8x32xf32>
    %109 = vector.extract_strided_slice %101 {offsets = [8, 0], sizes = [8, 32], strides = [1, 1]} : vector<24x32xf32> to vector<8x32xf32>
    %110 = vector.extract_strided_slice %13 {offsets = [4, 0], sizes = [1, 32], strides = [1, 1]} : vector<9x32xf32> to vector<1x32xf32>
    %111 = vector.shape_cast %110 : vector<1x32xf32> to vector<32xf32>
    %112 = vector.shape_cast %111 : vector<32xf32> to vector<1x32xf32>
    %113 = vector.broadcast %112 : vector<1x32xf32> to vector<8x32xf32>
    %114 = arith.mulf %109, %113 : vector<8x32xf32>
    %115 = arith.addf %108, %114 : vector<8x32xf32>
    %116 = vector.extract_strided_slice %101 {offsets = [16, 0], sizes = [8, 32], strides = [1, 1]} : vector<24x32xf32> to vector<8x32xf32>
    %117 = vector.extract_strided_slice %13 {offsets = [5, 0], sizes = [1, 32], strides = [1, 1]} : vector<9x32xf32> to vector<1x32xf32>
    %118 = vector.shape_cast %117 : vector<1x32xf32> to vector<32xf32>
    %119 = vector.shape_cast %118 : vector<32xf32> to vector<1x32xf32>
    %120 = vector.broadcast %119 : vector<1x32xf32> to vector<8x32xf32>
    %121 = arith.mulf %116, %120 : vector<8x32xf32>
    %122 = arith.addf %115, %121 : vector<8x32xf32>
    %123 = vector.extract_strided_slice %11 {offsets = [48, 0], sizes = [16, 32], strides = [1, 1]} : vector<256x32xf32> to vector<16x32xf32>
    %cst_29 = arith.constant dense<0.000000e+00> : vector<24x32xf32>
    %124 = tpu.matmul %12, %123, %cst_29 {dimension_numbers = #tpu.dot_dimension_numbers<[1], [0], [0], [1], [0, 0, 1, 1], [], []>} : vector<24x16xf32>, vector<16x32xf32>, vector<24x32xf32> -> vector<24x32xf32>
    %125 = vector.extract_strided_slice %124 {offsets = [0, 0], sizes = [8, 32], strides = [1, 1]} : vector<24x32xf32> to vector<8x32xf32>
    %126 = vector.extract_strided_slice %13 {offsets = [6, 0], sizes = [1, 32], strides = [1, 1]} : vector<9x32xf32> to vector<1x32xf32>
    %127 = vector.shape_cast %126 : vector<1x32xf32> to vector<32xf32>
    %128 = vector.shape_cast %127 : vector<32xf32> to vector<1x32xf32>
    %129 = vector.broadcast %128 : vector<1x32xf32> to vector<8x32xf32>
    %130 = arith.mulf %125, %129 : vector<8x32xf32>
    %131 = arith.addf %122, %130 : vector<8x32xf32>
    %132 = vector.extract_strided_slice %124 {offsets = [8, 0], sizes = [8, 32], strides = [1, 1]} : vector<24x32xf32> to vector<8x32xf32>
    %133 = vector.extract_strided_slice %13 {offsets = [7, 0], sizes = [1, 32], strides = [1, 1]} : vector<9x32xf32> to vector<1x32xf32>
    %134 = vector.shape_cast %133 : vector<1x32xf32> to vector<32xf32>
    %135 = vector.shape_cast %134 : vector<32xf32> to vector<1x32xf32>
    %136 = vector.broadcast %135 : vector<1x32xf32> to vector<8x32xf32>
    %137 = arith.mulf %132, %136 : vector<8x32xf32>
    %138 = arith.addf %131, %137 : vector<8x32xf32>
    %139 = vector.extract_strided_slice %124 {offsets = [16, 0], sizes = [8, 32], strides = [1, 1]} : vector<24x32xf32> to vector<8x32xf32>
    %140 = vector.extract_strided_slice %13 {offsets = [8, 0], sizes = [1, 32], strides = [1, 1]} : vector<9x32xf32> to vector<1x32xf32>
    %141 = vector.shape_cast %140 : vector<1x32xf32> to vector<32xf32>
    %142 = vector.shape_cast %141 : vector<32xf32> to vector<1x32xf32>
    %143 = vector.broadcast %142 : vector<1x32xf32> to vector<8x32xf32>
    %144 = arith.mulf %139, %143 : vector<8x32xf32>
    %145 = arith.addf %138, %144 : vector<8x32xf32>
    %146 = vector.broadcast %14 : vector<1x32xf32> to vector<8x32xf32>
    %147 = arith.mulf %145, %146 : vector<8x32xf32>
    %148 = vector.broadcast %15 : vector<1x32xf32> to vector<8x32xf32>
    %149 = arith.addf %147, %148 : vector<8x32xf32>
    %cst_30 = arith.constant 0.000000e+00 : f32
    %150 = vector.broadcast %cst_30 : f32 to vector<8x32xf32>
    %151 = arith.maximumf %149, %150 : vector<8x32xf32>
    %c0_31 = arith.constant 0 : index
    %c8 = arith.constant 8 : index
    %c0_32 = arith.constant 0 : index
    %152 = vector.load %arg9[%c0_31, %c8, %c0_32] : memref<1x64x32xf32, #tpu.memory_space<vmem>>, vector<1x8x32xf32>
    %153 = vector.shape_cast %152 : vector<1x8x32xf32> to vector<8x32xf32>
    %154 = vector.shape_cast %151 : vector<8x32xf32> to vector<1x8x32xf32>
    tpu.vector_store %arg9[%c0_31, %c8, %c0_32], %154 {strides = array<i32>} : memref<1x64x32xf32, #tpu.memory_space<vmem>>, vector<1x8x32xf32>,
    %cst_33 = arith.constant dense<0.000000e+00> : vector<32xf32>
    %155 = vector.multi_reduction <add>, %151, %cst_33 [0] : vector<8x32xf32> to vector<32xf32>
    %156 = vector.shape_cast %155 : vector<32xf32> to vector<1x32xf32>
    %157 = arith.addf %75, %156 : vector<1x32xf32>
    %cst_34 = arith.constant 0.000000e+00 : f32
    %158 = vector.broadcast %cst_34 : f32 to vector<8x32xf32>
    %159 = vector.extract_strided_slice %11 {offsets = [48, 0], sizes = [16, 32], strides = [1, 1]} : vector<256x32xf32> to vector<16x32xf32>
    %cst_35 = arith.constant dense<0.000000e+00> : vector<24x32xf32>
    %160 = tpu.matmul %12, %159, %cst_35 {dimension_numbers = #tpu.dot_dimension_numbers<[1], [0], [0], [1], [0, 0, 1, 1], [], []>} : vector<24x16xf32>, vector<16x32xf32>, vector<24x32xf32> -> vector<24x32xf32>
    %161 = vector.extract_strided_slice %160 {offsets = [0, 0], sizes = [8, 32], strides = [1, 1]} : vector<24x32xf32> to vector<8x32xf32>
    %162 = vector.extract_strided_slice %13 {offsets = [0, 0], sizes = [1, 32], strides = [1, 1]} : vector<9x32xf32> to vector<1x32xf32>
    %163 = vector.shape_cast %162 : vector<1x32xf32> to vector<32xf32>
    %164 = vector.shape_cast %163 : vector<32xf32> to vector<1x32xf32>
    %165 = vector.broadcast %164 : vector<1x32xf32> to vector<8x32xf32>
    %166 = arith.mulf %161, %165 : vector<8x32xf32>
    %167 = arith.addf %158, %166 : vector<8x32xf32>
    %168 = vector.extract_strided_slice %160 {offsets = [8, 0], sizes = [8, 32], strides = [1, 1]} : vector<24x32xf32> to vector<8x32xf32>
    %169 = vector.extract_strided_slice %13 {offsets = [1, 0], sizes = [1, 32], strides = [1, 1]} : vector<9x32xf32> to vector<1x32xf32>
    %170 = vector.shape_cast %169 : vector<1x32xf32> to vector<32xf32>
    %171 = vector.shape_cast %170 : vector<32xf32> to vector<1x32xf32>
    %172 = vector.broadcast %171 : vector<1x32xf32> to vector<8x32xf32>
    %173 = arith.mulf %168, %172 : vector<8x32xf32>
    %174 = arith.addf %167, %173 : vector<8x32xf32>
    %175 = vector.extract_strided_slice %160 {offsets = [16, 0], sizes = [8, 32], strides = [1, 1]} : vector<24x32xf32> to vector<8x32xf32>
    %176 = vector.extract_strided_slice %13 {offsets = [2, 0], sizes = [1, 32], strides = [1, 1]} : vector<9x32xf32> to vector<1x32xf32>
    %177 = vector.shape_cast %176 : vector<1x32xf32> to vector<32xf32>
    %178 = vector.shape_cast %177 : vector<32xf32> to vector<1x32xf32>
    %179 = vector.broadcast %178 : vector<1x32xf32> to vector<8x32xf32>
    %180 = arith.mulf %175, %179 : vector<8x32xf32>
    %181 = arith.addf %174, %180 : vector<8x32xf32>
    %182 = vector.extract_strided_slice %11 {offsets = [64, 0], sizes = [16, 32], strides = [1, 1]} : vector<256x32xf32> to vector<16x32xf32>
    %cst_36 = arith.constant dense<0.000000e+00> : vector<24x32xf32>
    %183 = tpu.matmul %12, %182, %cst_36 {dimension_numbers = #tpu.dot_dimension_numbers<[1], [0], [0], [1], [0, 0, 1, 1], [], []>} : vector<24x16xf32>, vector<16x32xf32>, vector<24x32xf32> -> vector<24x32xf32>
    %184 = vector.extract_strided_slice %183 {offsets = [0, 0], sizes = [8, 32], strides = [1, 1]} : vector<24x32xf32> to vector<8x32xf32>
    %185 = vector.extract_strided_slice %13 {offsets = [3, 0], sizes = [1, 32], strides = [1, 1]} : vector<9x32xf32> to vector<1x32xf32>
    %186 = vector.shape_cast %185 : vector<1x32xf32> to vector<32xf32>
    %187 = vector.shape_cast %186 : vector<32xf32> to vector<1x32xf32>
    %188 = vector.broadcast %187 : vector<1x32xf32> to vector<8x32xf32>
    %189 = arith.mulf %184, %188 : vector<8x32xf32>
    %190 = arith.addf %181, %189 : vector<8x32xf32>
    %191 = vector.extract_strided_slice %183 {offsets = [8, 0], sizes = [8, 32], strides = [1, 1]} : vector<24x32xf32> to vector<8x32xf32>
    %192 = vector.extract_strided_slice %13 {offsets = [4, 0], sizes = [1, 32], strides = [1, 1]} : vector<9x32xf32> to vector<1x32xf32>
    %193 = vector.shape_cast %192 : vector<1x32xf32> to vector<32xf32>
    %194 = vector.shape_cast %193 : vector<32xf32> to vector<1x32xf32>
    %195 = vector.broadcast %194 : vector<1x32xf32> to vector<8x32xf32>
    %196 = arith.mulf %191, %195 : vector<8x32xf32>
    %197 = arith.addf %190, %196 : vector<8x32xf32>
    %198 = vector.extract_strided_slice %183 {offsets = [16, 0], sizes = [8, 32], strides = [1, 1]} : vector<24x32xf32> to vector<8x32xf32>
    %199 = vector.extract_strided_slice %13 {offsets = [5, 0], sizes = [1, 32], strides = [1, 1]} : vector<9x32xf32> to vector<1x32xf32>
    %200 = vector.shape_cast %199 : vector<1x32xf32> to vector<32xf32>
    %201 = vector.shape_cast %200 : vector<32xf32> to vector<1x32xf32>
    %202 = vector.broadcast %201 : vector<1x32xf32> to vector<8x32xf32>
    %203 = arith.mulf %198, %202 : vector<8x32xf32>
    %204 = arith.addf %197, %203 : vector<8x32xf32>
    %205 = vector.extract_strided_slice %11 {offsets = [80, 0], sizes = [16, 32], strides = [1, 1]} : vector<256x32xf32> to vector<16x32xf32>
    %cst_37 = arith.constant dense<0.000000e+00> : vector<24x32xf32>
    %206 = tpu.matmul %12, %205, %cst_37 {dimension_numbers = #tpu.dot_dimension_numbers<[1], [0], [0], [1], [0, 0, 1, 1], [], []>} : vector<24x16xf32>, vector<16x32xf32>, vector<24x32xf32> -> vector<24x32xf32>
    %207 = vector.extract_strided_slice %206 {offsets = [0, 0], sizes = [8, 32], strides = [1, 1]} : vector<24x32xf32> to vector<8x32xf32>
    %208 = vector.extract_strided_slice %13 {offsets = [6, 0], sizes = [1, 32], strides = [1, 1]} : vector<9x32xf32> to vector<1x32xf32>
    %209 = vector.shape_cast %208 : vector<1x32xf32> to vector<32xf32>
    %210 = vector.shape_cast %209 : vector<32xf32> to vector<1x32xf32>
    %211 = vector.broadcast %210 : vector<1x32xf32> to vector<8x32xf32>
    %212 = arith.mulf %207, %211 : vector<8x32xf32>
    %213 = arith.addf %204, %212 : vector<8x32xf32>
    %214 = vector.extract_strided_slice %206 {offsets = [8, 0], sizes = [8, 32], strides = [1, 1]} : vector<24x32xf32> to vector<8x32xf32>
    %215 = vector.extract_strided_slice %13 {offsets = [7, 0], sizes = [1, 32], strides = [1, 1]} : vector<9x32xf32> to vector<1x32xf32>
    %216 = vector.shape_cast %215 : vector<1x32xf32> to vector<32xf32>
    %217 = vector.shape_cast %216 : vector<32xf32> to vector<1x32xf32>
    %218 = vector.broadcast %217 : vector<1x32xf32> to vector<8x32xf32>
    %219 = arith.mulf %214, %218 : vector<8x32xf32>
    %220 = arith.addf %213, %219 : vector<8x32xf32>
    %221 = vector.extract_strided_slice %206 {offsets = [16, 0], sizes = [8, 32], strides = [1, 1]} : vector<24x32xf32> to vector<8x32xf32>
    %222 = vector.extract_strided_slice %13 {offsets = [8, 0], sizes = [1, 32], strides = [1, 1]} : vector<9x32xf32> to vector<1x32xf32>
    %223 = vector.shape_cast %222 : vector<1x32xf32> to vector<32xf32>
    %224 = vector.shape_cast %223 : vector<32xf32> to vector<1x32xf32>
    %225 = vector.broadcast %224 : vector<1x32xf32> to vector<8x32xf32>
    %226 = arith.mulf %221, %225 : vector<8x32xf32>
    %227 = arith.addf %220, %226 : vector<8x32xf32>
    %228 = vector.broadcast %14 : vector<1x32xf32> to vector<8x32xf32>
    %229 = arith.mulf %227, %228 : vector<8x32xf32>
    %230 = vector.broadcast %15 : vector<1x32xf32> to vector<8x32xf32>
    %231 = arith.addf %229, %230 : vector<8x32xf32>
    %cst_38 = arith.constant 0.000000e+00 : f32
    %232 = vector.broadcast %cst_38 : f32 to vector<8x32xf32>
    %233 = arith.maximumf %231, %232 : vector<8x32xf32>
    %c0_39 = arith.constant 0 : index
    %c16 = arith.constant 16 : index
    %c0_40 = arith.constant 0 : index
    %234 = vector.load %arg9[%c0_39, %c16, %c0_40] : memref<1x64x32xf32, #tpu.memory_space<vmem>>, vector<1x8x32xf32>
    %235 = vector.shape_cast %234 : vector<1x8x32xf32> to vector<8x32xf32>
    %236 = vector.shape_cast %233 : vector<8x32xf32> to vector<1x8x32xf32>
    tpu.vector_store %arg9[%c0_39, %c16, %c0_40], %236 {strides = array<i32>} : memref<1x64x32xf32, #tpu.memory_space<vmem>>, vector<1x8x32xf32>,
    %cst_41 = arith.constant dense<0.000000e+00> : vector<32xf32>
    %237 = vector.multi_reduction <add>, %233, %cst_41 [0] : vector<8x32xf32> to vector<32xf32>
    %238 = vector.shape_cast %237 : vector<32xf32> to vector<1x32xf32>
    %239 = arith.addf %157, %238 : vector<1x32xf32>
    %cst_42 = arith.constant 0.000000e+00 : f32
    %240 = vector.broadcast %cst_42 : f32 to vector<8x32xf32>
    %241 = vector.extract_strided_slice %11 {offsets = [80, 0], sizes = [16, 32], strides = [1, 1]} : vector<256x32xf32> to vector<16x32xf32>
    %cst_43 = arith.constant dense<0.000000e+00> : vector<24x32xf32>
    %242 = tpu.matmul %12, %241, %cst_43 {dimension_numbers = #tpu.dot_dimension_numbers<[1], [0], [0], [1], [0, 0, 1, 1], [], []>} : vector<24x16xf32>, vector<16x32xf32>, vector<24x32xf32> -> vector<24x32xf32>
    %243 = vector.extract_strided_slice %242 {offsets = [0, 0], sizes = [8, 32], strides = [1, 1]} : vector<24x32xf32> to vector<8x32xf32>
    %244 = vector.extract_strided_slice %13 {offsets = [0, 0], sizes = [1, 32], strides = [1, 1]} : vector<9x32xf32> to vector<1x32xf32>
    %245 = vector.shape_cast %244 : vector<1x32xf32> to vector<32xf32>
    %246 = vector.shape_cast %245 : vector<32xf32> to vector<1x32xf32>
    %247 = vector.broadcast %246 : vector<1x32xf32> to vector<8x32xf32>
    %248 = arith.mulf %243, %247 : vector<8x32xf32>
    %249 = arith.addf %240, %248 : vector<8x32xf32>
    %250 = vector.extract_strided_slice %242 {offsets = [8, 0], sizes = [8, 32], strides = [1, 1]} : vector<24x32xf32> to vector<8x32xf32>
    %251 = vector.extract_strided_slice %13 {offsets = [1, 0], sizes = [1, 32], strides = [1, 1]} : vector<9x32xf32> to vector<1x32xf32>
    %252 = vector.shape_cast %251 : vector<1x32xf32> to vector<32xf32>
    %253 = vector.shape_cast %252 : vector<32xf32> to vector<1x32xf32>
    %254 = vector.broadcast %253 : vector<1x32xf32> to vector<8x32xf32>
    %255 = arith.mulf %250, %254 : vector<8x32xf32>
    %256 = arith.addf %249, %255 : vector<8x32xf32>
    %257 = vector.extract_strided_slice %242 {offsets = [16, 0], sizes = [8, 32], strides = [1, 1]} : vector<24x32xf32> to vector<8x32xf32>
    %258 = vector.extract_strided_slice %13 {offsets = [2, 0], sizes = [1, 32], strides = [1, 1]} : vector<9x32xf32> to vector<1x32xf32>
    %259 = vector.shape_cast %258 : vector<1x32xf32> to vector<32xf32>
    %260 = vector.shape_cast %259 : vector<32xf32> to vector<1x32xf32>
    %261 = vector.broadcast %260 : vector<1x32xf32> to vector<8x32xf32>
    %262 = arith.mulf %257, %261 : vector<8x32xf32>
    %263 = arith.addf %256, %262 : vector<8x32xf32>
    %264 = vector.extract_strided_slice %11 {offsets = [96, 0], sizes = [16, 32], strides = [1, 1]} : vector<256x32xf32> to vector<16x32xf32>
    %cst_44 = arith.constant dense<0.000000e+00> : vector<24x32xf32>
    %265 = tpu.matmul %12, %264, %cst_44 {dimension_numbers = #tpu.dot_dimension_numbers<[1], [0], [0], [1], [0, 0, 1, 1], [], []>} : vector<24x16xf32>, vector<16x32xf32>, vector<24x32xf32> -> vector<24x32xf32>
    %266 = vector.extract_strided_slice %265 {offsets = [0, 0], sizes = [8, 32], strides = [1, 1]} : vector<24x32xf32> to vector<8x32xf32>
    %267 = vector.extract_strided_slice %13 {offsets = [3, 0], sizes = [1, 32], strides = [1, 1]} : vector<9x32xf32> to vector<1x32xf32>
    %268 = vector.shape_cast %267 : vector<1x32xf32> to vector<32xf32>
    %269 = vector.shape_cast %268 : vector<32xf32> to vector<1x32xf32>
    %270 = vector.broadcast %269 : vector<1x32xf32> to vector<8x32xf32>
    %271 = arith.mulf %266, %270 : vector<8x32xf32>
    %272 = arith.addf %263, %271 : vector<8x32xf32>
    %273 = vector.extract_strided_slice %265 {offsets = [8, 0], sizes = [8, 32], strides = [1, 1]} : vector<24x32xf32> to vector<8x32xf32>
    %274 = vector.extract_strided_slice %13 {offsets = [4, 0], sizes = [1, 32], strides = [1, 1]} : vector<9x32xf32> to vector<1x32xf32>
    %275 = vector.shape_cast %274 : vector<1x32xf32> to vector<32xf32>
    %276 = vector.shape_cast %275 : vector<32xf32> to vector<1x32xf32>
    %277 = vector.broadcast %276 : vector<1x32xf32> to vector<8x32xf32>
    %278 = arith.mulf %273, %277 : vector<8x32xf32>
    %279 = arith.addf %272, %278 : vector<8x32xf32>
    %280 = vector.extract_strided_slice %265 {offsets = [16, 0], sizes = [8, 32], strides = [1, 1]} : vector<24x32xf32> to vector<8x32xf32>
    %281 = vector.extract_strided_slice %13 {offsets = [5, 0], sizes = [1, 32], strides = [1, 1]} : vector<9x32xf32> to vector<1x32xf32>
    %282 = vector.shape_cast %281 : vector<1x32xf32> to vector<32xf32>
    %283 = vector.shape_cast %282 : vector<32xf32> to vector<1x32xf32>
    %284 = vector.broadcast %283 : vector<1x32xf32> to vector<8x32xf32>
    %285 = arith.mulf %280, %284 : vector<8x32xf32>
    %286 = arith.addf %279, %285 : vector<8x32xf32>
    %287 = vector.extract_strided_slice %11 {offsets = [112, 0], sizes = [16, 32], strides = [1, 1]} : vector<256x32xf32> to vector<16x32xf32>
    %cst_45 = arith.constant dense<0.000000e+00> : vector<24x32xf32>
    %288 = tpu.matmul %12, %287, %cst_45 {dimension_numbers = #tpu.dot_dimension_numbers<[1], [0], [0], [1], [0, 0, 1, 1], [], []>} : vector<24x16xf32>, vector<16x32xf32>, vector<24x32xf32> -> vector<24x32xf32>
    %289 = vector.extract_strided_slice %288 {offsets = [0, 0], sizes = [8, 32], strides = [1, 1]} : vector<24x32xf32> to vector<8x32xf32>
    %290 = vector.extract_strided_slice %13 {offsets = [6, 0], sizes = [1, 32], strides = [1, 1]} : vector<9x32xf32> to vector<1x32xf32>
    %291 = vector.shape_cast %290 : vector<1x32xf32> to vector<32xf32>
    %292 = vector.shape_cast %291 : vector<32xf32> to vector<1x32xf32>
    %293 = vector.broadcast %292 : vector<1x32xf32> to vector<8x32xf32>
    %294 = arith.mulf %289, %293 : vector<8x32xf32>
    %295 = arith.addf %286, %294 : vector<8x32xf32>
    %296 = vector.extract_strided_slice %288 {offsets = [8, 0], sizes = [8, 32], strides = [1, 1]} : vector<24x32xf32> to vector<8x32xf32>
    %297 = vector.extract_strided_slice %13 {offsets = [7, 0], sizes = [1, 32], strides = [1, 1]} : vector<9x32xf32> to vector<1x32xf32>
    %298 = vector.shape_cast %297 : vector<1x32xf32> to vector<32xf32>
    %299 = vector.shape_cast %298 : vector<32xf32> to vector<1x32xf32>
    %300 = vector.broadcast %299 : vector<1x32xf32> to vector<8x32xf32>
    %301 = arith.mulf %296, %300 : vector<8x32xf32>
    %302 = arith.addf %295, %301 : vector<8x32xf32>
    %303 = vector.extract_strided_slice %288 {offsets = [16, 0], sizes = [8, 32], strides = [1, 1]} : vector<24x32xf32> to vector<8x32xf32>
    %304 = vector.extract_strided_slice %13 {offsets = [8, 0], sizes = [1, 32], strides = [1, 1]} : vector<9x32xf32> to vector<1x32xf32>
    %305 = vector.shape_cast %304 : vector<1x32xf32> to vector<32xf32>
    %306 = vector.shape_cast %305 : vector<32xf32> to vector<1x32xf32>
    %307 = vector.broadcast %306 : vector<1x32xf32> to vector<8x32xf32>
    %308 = arith.mulf %303, %307 : vector<8x32xf32>
    %309 = arith.addf %302, %308 : vector<8x32xf32>
    %310 = vector.broadcast %14 : vector<1x32xf32> to vector<8x32xf32>
    %311 = arith.mulf %309, %310 : vector<8x32xf32>
    %312 = vector.broadcast %15 : vector<1x32xf32> to vector<8x32xf32>
    %313 = arith.addf %311, %312 : vector<8x32xf32>
    %cst_46 = arith.constant 0.000000e+00 : f32
    %314 = vector.broadcast %cst_46 : f32 to vector<8x32xf32>
    %315 = arith.maximumf %313, %314 : vector<8x32xf32>
    %c0_47 = arith.constant 0 : index
    %c24 = arith.constant 24 : index
    %c0_48 = arith.constant 0 : index
    %316 = vector.load %arg9[%c0_47, %c24, %c0_48] : memref<1x64x32xf32, #tpu.memory_space<vmem>>, vector<1x8x32xf32>
    %317 = vector.shape_cast %316 : vector<1x8x32xf32> to vector<8x32xf32>
    %318 = vector.shape_cast %315 : vector<8x32xf32> to vector<1x8x32xf32>
    tpu.vector_store %arg9[%c0_47, %c24, %c0_48], %318 {strides = array<i32>} : memref<1x64x32xf32, #tpu.memory_space<vmem>>, vector<1x8x32xf32>,
    %cst_49 = arith.constant dense<0.000000e+00> : vector<32xf32>
    %319 = vector.multi_reduction <add>, %315, %cst_49 [0] : vector<8x32xf32> to vector<32xf32>
    %320 = vector.shape_cast %319 : vector<32xf32> to vector<1x32xf32>
    %321 = arith.addf %239, %320 : vector<1x32xf32>
    %cst_50 = arith.constant 0.000000e+00 : f32
    %322 = vector.broadcast %cst_50 : f32 to vector<8x32xf32>
    %323 = vector.extract_strided_slice %11 {offsets = [112, 0], sizes = [16, 32], strides = [1, 1]} : vector<256x32xf32> to vector<16x32xf32>
    %cst_51 = arith.constant dense<0.000000e+00> : vector<24x32xf32>
    %324 = tpu.matmul %12, %323, %cst_51 {dimension_numbers = #tpu.dot_dimension_numbers<[1], [0], [0], [1], [0, 0, 1, 1], [], []>} : vector<24x16xf32>, vector<16x32xf32>, vector<24x32xf32> -> vector<24x32xf32>
    %325 = vector.extract_strided_slice %324 {offsets = [0, 0], sizes = [8, 32], strides = [1, 1]} : vector<24x32xf32> to vector<8x32xf32>
    %326 = vector.extract_strided_slice %13 {offsets = [0, 0], sizes = [1, 32], strides = [1, 1]} : vector<9x32xf32> to vector<1x32xf32>
    %327 = vector.shape_cast %326 : vector<1x32xf32> to vector<32xf32>
    %328 = vector.shape_cast %327 : vector<32xf32> to vector<1x32xf32>
    %329 = vector.broadcast %328 : vector<1x32xf32> to vector<8x32xf32>
    %330 = arith.mulf %325, %329 : vector<8x32xf32>
    %331 = arith.addf %322, %330 : vector<8x32xf32>
    %332 = vector.extract_strided_slice %324 {offsets = [8, 0], sizes = [8, 32], strides = [1, 1]} : vector<24x32xf32> to vector<8x32xf32>
    %333 = vector.extract_strided_slice %13 {offsets = [1, 0], sizes = [1, 32], strides = [1, 1]} : vector<9x32xf32> to vector<1x32xf32>
    %334 = vector.shape_cast %333 : vector<1x32xf32> to vector<32xf32>
    %335 = vector.shape_cast %334 : vector<32xf32> to vector<1x32xf32>
    %336 = vector.broadcast %335 : vector<1x32xf32> to vector<8x32xf32>
    %337 = arith.mulf %332, %336 : vector<8x32xf32>
    %338 = arith.addf %331, %337 : vector<8x32xf32>
    %339 = vector.extract_strided_slice %324 {offsets = [16, 0], sizes = [8, 32], strides = [1, 1]} : vector<24x32xf32> to vector<8x32xf32>
    %340 = vector.extract_strided_slice %13 {offsets = [2, 0], sizes = [1, 32], strides = [1, 1]} : vector<9x32xf32> to vector<1x32xf32>
    %341 = vector.shape_cast %340 : vector<1x32xf32> to vector<32xf32>
    %342 = vector.shape_cast %341 : vector<32xf32> to vector<1x32xf32>
    %343 = vector.broadcast %342 : vector<1x32xf32> to vector<8x32xf32>
    %344 = arith.mulf %339, %343 : vector<8x32xf32>
    %345 = arith.addf %338, %344 : vector<8x32xf32>
    %346 = vector.extract_strided_slice %11 {offsets = [128, 0], sizes = [16, 32], strides = [1, 1]} : vector<256x32xf32> to vector<16x32xf32>
    %cst_52 = arith.constant dense<0.000000e+00> : vector<24x32xf32>
    %347 = tpu.matmul %12, %346, %cst_52 {dimension_numbers = #tpu.dot_dimension_numbers<[1], [0], [0], [1], [0, 0, 1, 1], [], []>} : vector<24x16xf32>, vector<16x32xf32>, vector<24x32xf32> -> vector<24x32xf32>
    %348 = vector.extract_strided_slice %347 {offsets = [0, 0], sizes = [8, 32], strides = [1, 1]} : vector<24x32xf32> to vector<8x32xf32>
    %349 = vector.extract_strided_slice %13 {offsets = [3, 0], sizes = [1, 32], strides = [1, 1]} : vector<9x32xf32> to vector<1x32xf32>
    %350 = vector.shape_cast %349 : vector<1x32xf32> to vector<32xf32>
    %351 = vector.shape_cast %350 : vector<32xf32> to vector<1x32xf32>
    %352 = vector.broadcast %351 : vector<1x32xf32> to vector<8x32xf32>
    %353 = arith.mulf %348, %352 : vector<8x32xf32>
    %354 = arith.addf %345, %353 : vector<8x32xf32>
    %355 = vector.extract_strided_slice %347 {offsets = [8, 0], sizes = [8, 32], strides = [1, 1]} : vector<24x32xf32> to vector<8x32xf32>
    %356 = vector.extract_strided_slice %13 {offsets = [4, 0], sizes = [1, 32], strides = [1, 1]} : vector<9x32xf32> to vector<1x32xf32>
    %357 = vector.shape_cast %356 : vector<1x32xf32> to vector<32xf32>
    %358 = vector.shape_cast %357 : vector<32xf32> to vector<1x32xf32>
    %359 = vector.broadcast %358 : vector<1x32xf32> to vector<8x32xf32>
    %360 = arith.mulf %355, %359 : vector<8x32xf32>
    %361 = arith.addf %354, %360 : vector<8x32xf32>
    %362 = vector.extract_strided_slice %347 {offsets = [16, 0], sizes = [8, 32], strides = [1, 1]} : vector<24x32xf32> to vector<8x32xf32>
    %363 = vector.extract_strided_slice %13 {offsets = [5, 0], sizes = [1, 32], strides = [1, 1]} : vector<9x32xf32> to vector<1x32xf32>
    %364 = vector.shape_cast %363 : vector<1x32xf32> to vector<32xf32>
    %365 = vector.shape_cast %364 : vector<32xf32> to vector<1x32xf32>
    %366 = vector.broadcast %365 : vector<1x32xf32> to vector<8x32xf32>
    %367 = arith.mulf %362, %366 : vector<8x32xf32>
    %368 = arith.addf %361, %367 : vector<8x32xf32>
    %369 = vector.extract_strided_slice %11 {offsets = [144, 0], sizes = [16, 32], strides = [1, 1]} : vector<256x32xf32> to vector<16x32xf32>
    %cst_53 = arith.constant dense<0.000000e+00> : vector<24x32xf32>
    %370 = tpu.matmul %12, %369, %cst_53 {dimension_numbers = #tpu.dot_dimension_numbers<[1], [0], [0], [1], [0, 0, 1, 1], [], []>} : vector<24x16xf32>, vector<16x32xf32>, vector<24x32xf32> -> vector<24x32xf32>
    %371 = vector.extract_strided_slice %370 {offsets = [0, 0], sizes = [8, 32], strides = [1, 1]} : vector<24x32xf32> to vector<8x32xf32>
    %372 = vector.extract_strided_slice %13 {offsets = [6, 0], sizes = [1, 32], strides = [1, 1]} : vector<9x32xf32> to vector<1x32xf32>
    %373 = vector.shape_cast %372 : vector<1x32xf32> to vector<32xf32>
    %374 = vector.shape_cast %373 : vector<32xf32> to vector<1x32xf32>
    %375 = vector.broadcast %374 : vector<1x32xf32> to vector<8x32xf32>
    %376 = arith.mulf %371, %375 : vector<8x32xf32>
    %377 = arith.addf %368, %376 : vector<8x32xf32>
    %378 = vector.extract_strided_slice %370 {offsets = [8, 0], sizes = [8, 32], strides = [1, 1]} : vector<24x32xf32> to vector<8x32xf32>
    %379 = vector.extract_strided_slice %13 {offsets = [7, 0], sizes = [1, 32], strides = [1, 1]} : vector<9x32xf32> to vector<1x32xf32>
    %380 = vector.shape_cast %379 : vector<1x32xf32> to vector<32xf32>
    %381 = vector.shape_cast %380 : vector<32xf32> to vector<1x32xf32>
    %382 = vector.broadcast %381 : vector<1x32xf32> to vector<8x32xf32>
    %383 = arith.mulf %378, %382 : vector<8x32xf32>
    %384 = arith.addf %377, %383 : vector<8x32xf32>
    %385 = vector.extract_strided_slice %370 {offsets = [16, 0], sizes = [8, 32], strides = [1, 1]} : vector<24x32xf32> to vector<8x32xf32>
    %386 = vector.extract_strided_slice %13 {offsets = [8, 0], sizes = [1, 32], strides = [1, 1]} : vector<9x32xf32> to vector<1x32xf32>
    %387 = vector.shape_cast %386 : vector<1x32xf32> to vector<32xf32>
    %388 = vector.shape_cast %387 : vector<32xf32> to vector<1x32xf32>
    %389 = vector.broadcast %388 : vector<1x32xf32> to vector<8x32xf32>
    %390 = arith.mulf %385, %389 : vector<8x32xf32>
    %391 = arith.addf %384, %390 : vector<8x32xf32>
    %392 = vector.broadcast %14 : vector<1x32xf32> to vector<8x32xf32>
    %393 = arith.mulf %391, %392 : vector<8x32xf32>
    %394 = vector.broadcast %15 : vector<1x32xf32> to vector<8x32xf32>
    %395 = arith.addf %393, %394 : vector<8x32xf32>
    %cst_54 = arith.constant 0.000000e+00 : f32
    %396 = vector.broadcast %cst_54 : f32 to vector<8x32xf32>
    %397 = arith.maximumf %395, %396 : vector<8x32xf32>
    %c0_55 = arith.constant 0 : index
    %c32 = arith.constant 32 : index
    %c0_56 = arith.constant 0 : index
    %398 = vector.load %arg9[%c0_55, %c32, %c0_56] : memref<1x64x32xf32, #tpu.memory_space<vmem>>, vector<1x8x32xf32>
    %399 = vector.shape_cast %398 : vector<1x8x32xf32> to vector<8x32xf32>
    %400 = vector.shape_cast %397 : vector<8x32xf32> to vector<1x8x32xf32>
    tpu.vector_store %arg9[%c0_55, %c32, %c0_56], %400 {strides = array<i32>} : memref<1x64x32xf32, #tpu.memory_space<vmem>>, vector<1x8x32xf32>,
    %cst_57 = arith.constant dense<0.000000e+00> : vector<32xf32>
    %401 = vector.multi_reduction <add>, %397, %cst_57 [0] : vector<8x32xf32> to vector<32xf32>
    %402 = vector.shape_cast %401 : vector<32xf32> to vector<1x32xf32>
    %403 = arith.addf %321, %402 : vector<1x32xf32>
    %cst_58 = arith.constant 0.000000e+00 : f32
    %404 = vector.broadcast %cst_58 : f32 to vector<8x32xf32>
    %405 = vector.extract_strided_slice %11 {offsets = [144, 0], sizes = [16, 32], strides = [1, 1]} : vector<256x32xf32> to vector<16x32xf32>
    %cst_59 = arith.constant dense<0.000000e+00> : vector<24x32xf32>
    %406 = tpu.matmul %12, %405, %cst_59 {dimension_numbers = #tpu.dot_dimension_numbers<[1], [0], [0], [1], [0, 0, 1, 1], [], []>} : vector<24x16xf32>, vector<16x32xf32>, vector<24x32xf32> -> vector<24x32xf32>
    %407 = vector.extract_strided_slice %406 {offsets = [0, 0], sizes = [8, 32], strides = [1, 1]} : vector<24x32xf32> to vector<8x32xf32>
    %408 = vector.extract_strided_slice %13 {offsets = [0, 0], sizes = [1, 32], strides = [1, 1]} : vector<9x32xf32> to vector<1x32xf32>
    %409 = vector.shape_cast %408 : vector<1x32xf32> to vector<32xf32>
    %410 = vector.shape_cast %409 : vector<32xf32> to vector<1x32xf32>
    %411 = vector.broadcast %410 : vector<1x32xf32> to vector<8x32xf32>
    %412 = arith.mulf %407, %411 : vector<8x32xf32>
    %413 = arith.addf %404, %412 : vector<8x32xf32>
    %414 = vector.extract_strided_slice %406 {offsets = [8, 0], sizes = [8, 32], strides = [1, 1]} : vector<24x32xf32> to vector<8x32xf32>
    %415 = vector.extract_strided_slice %13 {offsets = [1, 0], sizes = [1, 32], strides = [1, 1]} : vector<9x32xf32> to vector<1x32xf32>
    %416 = vector.shape_cast %415 : vector<1x32xf32> to vector<32xf32>
    %417 = vector.shape_cast %416 : vector<32xf32> to vector<1x32xf32>
    %418 = vector.broadcast %417 : vector<1x32xf32> to vector<8x32xf32>
    %419 = arith.mulf %414, %418 : vector<8x32xf32>
    %420 = arith.addf %413, %419 : vector<8x32xf32>
    %421 = vector.extract_strided_slice %406 {offsets = [16, 0], sizes = [8, 32], strides = [1, 1]} : vector<24x32xf32> to vector<8x32xf32>
    %422 = vector.extract_strided_slice %13 {offsets = [2, 0], sizes = [1, 32], strides = [1, 1]} : vector<9x32xf32> to vector<1x32xf32>
    %423 = vector.shape_cast %422 : vector<1x32xf32> to vector<32xf32>
    %424 = vector.shape_cast %423 : vector<32xf32> to vector<1x32xf32>
    %425 = vector.broadcast %424 : vector<1x32xf32> to vector<8x32xf32>
    %426 = arith.mulf %421, %425 : vector<8x32xf32>
    %427 = arith.addf %420, %426 : vector<8x32xf32>
    %428 = vector.extract_strided_slice %11 {offsets = [160, 0], sizes = [16, 32], strides = [1, 1]} : vector<256x32xf32> to vector<16x32xf32>
    %cst_60 = arith.constant dense<0.000000e+00> : vector<24x32xf32>
    %429 = tpu.matmul %12, %428, %cst_60 {dimension_numbers = #tpu.dot_dimension_numbers<[1], [0], [0], [1], [0, 0, 1, 1], [], []>} : vector<24x16xf32>, vector<16x32xf32>, vector<24x32xf32> -> vector<24x32xf32>
    %430 = vector.extract_strided_slice %429 {offsets = [0, 0], sizes = [8, 32], strides = [1, 1]} : vector<24x32xf32> to vector<8x32xf32>
    %431 = vector.extract_strided_slice %13 {offsets = [3, 0], sizes = [1, 32], strides = [1, 1]} : vector<9x32xf32> to vector<1x32xf32>
    %432 = vector.shape_cast %431 : vector<1x32xf32> to vector<32xf32>
    %433 = vector.shape_cast %432 : vector<32xf32> to vector<1x32xf32>
    %434 = vector.broadcast %433 : vector<1x32xf32> to vector<8x32xf32>
    %435 = arith.mulf %430, %434 : vector<8x32xf32>
    %436 = arith.addf %427, %435 : vector<8x32xf32>
    %437 = vector.extract_strided_slice %429 {offsets = [8, 0], sizes = [8, 32], strides = [1, 1]} : vector<24x32xf32> to vector<8x32xf32>
    %438 = vector.extract_strided_slice %13 {offsets = [4, 0], sizes = [1, 32], strides = [1, 1]} : vector<9x32xf32> to vector<1x32xf32>
    %439 = vector.shape_cast %438 : vector<1x32xf32> to vector<32xf32>
    %440 = vector.shape_cast %439 : vector<32xf32> to vector<1x32xf32>
    %441 = vector.broadcast %440 : vector<1x32xf32> to vector<8x32xf32>
    %442 = arith.mulf %437, %441 : vector<8x32xf32>
    %443 = arith.addf %436, %442 : vector<8x32xf32>
    %444 = vector.extract_strided_slice %429 {offsets = [16, 0], sizes = [8, 32], strides = [1, 1]} : vector<24x32xf32> to vector<8x32xf32>
    %445 = vector.extract_strided_slice %13 {offsets = [5, 0], sizes = [1, 32], strides = [1, 1]} : vector<9x32xf32> to vector<1x32xf32>
    %446 = vector.shape_cast %445 : vector<1x32xf32> to vector<32xf32>
    %447 = vector.shape_cast %446 : vector<32xf32> to vector<1x32xf32>
    %448 = vector.broadcast %447 : vector<1x32xf32> to vector<8x32xf32>
    %449 = arith.mulf %444, %448 : vector<8x32xf32>
    %450 = arith.addf %443, %449 : vector<8x32xf32>
    %451 = vector.extract_strided_slice %11 {offsets = [176, 0], sizes = [16, 32], strides = [1, 1]} : vector<256x32xf32> to vector<16x32xf32>
    %cst_61 = arith.constant dense<0.000000e+00> : vector<24x32xf32>
    %452 = tpu.matmul %12, %451, %cst_61 {dimension_numbers = #tpu.dot_dimension_numbers<[1], [0], [0], [1], [0, 0, 1, 1], [], []>} : vector<24x16xf32>, vector<16x32xf32>, vector<24x32xf32> -> vector<24x32xf32>
    %453 = vector.extract_strided_slice %452 {offsets = [0, 0], sizes = [8, 32], strides = [1, 1]} : vector<24x32xf32> to vector<8x32xf32>
    %454 = vector.extract_strided_slice %13 {offsets = [6, 0], sizes = [1, 32], strides = [1, 1]} : vector<9x32xf32> to vector<1x32xf32>
    %455 = vector.shape_cast %454 : vector<1x32xf32> to vector<32xf32>
    %456 = vector.shape_cast %455 : vector<32xf32> to vector<1x32xf32>
    %457 = vector.broadcast %456 : vector<1x32xf32> to vector<8x32xf32>
    %458 = arith.mulf %453, %457 : vector<8x32xf32>
    %459 = arith.addf %450, %458 : vector<8x32xf32>
    %460 = vector.extract_strided_slice %452 {offsets = [8, 0], sizes = [8, 32], strides = [1, 1]} : vector<24x32xf32> to vector<8x32xf32>
    %461 = vector.extract_strided_slice %13 {offsets = [7, 0], sizes = [1, 32], strides = [1, 1]} : vector<9x32xf32> to vector<1x32xf32>
    %462 = vector.shape_cast %461 : vector<1x32xf32> to vector<32xf32>
    %463 = vector.shape_cast %462 : vector<32xf32> to vector<1x32xf32>
    %464 = vector.broadcast %463 : vector<1x32xf32> to vector<8x32xf32>
    %465 = arith.mulf %460, %464 : vector<8x32xf32>
    %466 = arith.addf %459, %465 : vector<8x32xf32>
    %467 = vector.extract_strided_slice %452 {offsets = [16, 0], sizes = [8, 32], strides = [1, 1]} : vector<24x32xf32> to vector<8x32xf32>
    %468 = vector.extract_strided_slice %13 {offsets = [8, 0], sizes = [1, 32], strides = [1, 1]} : vector<9x32xf32> to vector<1x32xf32>
    %469 = vector.shape_cast %468 : vector<1x32xf32> to vector<32xf32>
    %470 = vector.shape_cast %469 : vector<32xf32> to vector<1x32xf32>
    %471 = vector.broadcast %470 : vector<1x32xf32> to vector<8x32xf32>
    %472 = arith.mulf %467, %471 : vector<8x32xf32>
    %473 = arith.addf %466, %472 : vector<8x32xf32>
    %474 = vector.broadcast %14 : vector<1x32xf32> to vector<8x32xf32>
    %475 = arith.mulf %473, %474 : vector<8x32xf32>
    %476 = vector.broadcast %15 : vector<1x32xf32> to vector<8x32xf32>
    %477 = arith.addf %475, %476 : vector<8x32xf32>
    %cst_62 = arith.constant 0.000000e+00 : f32
    %478 = vector.broadcast %cst_62 : f32 to vector<8x32xf32>
    %479 = arith.maximumf %477, %478 : vector<8x32xf32>
    %c0_63 = arith.constant 0 : index
    %c40 = arith.constant 40 : index
    %c0_64 = arith.constant 0 : index
    %480 = vector.load %arg9[%c0_63, %c40, %c0_64] : memref<1x64x32xf32, #tpu.memory_space<vmem>>, vector<1x8x32xf32>
    %481 = vector.shape_cast %480 : vector<1x8x32xf32> to vector<8x32xf32>
    %482 = vector.shape_cast %479 : vector<8x32xf32> to vector<1x8x32xf32>
    tpu.vector_store %arg9[%c0_63, %c40, %c0_64], %482 {strides = array<i32>} : memref<1x64x32xf32, #tpu.memory_space<vmem>>, vector<1x8x32xf32>,
    %cst_65 = arith.constant dense<0.000000e+00> : vector<32xf32>
    %483 = vector.multi_reduction <add>, %479, %cst_65 [0] : vector<8x32xf32> to vector<32xf32>
    %484 = vector.shape_cast %483 : vector<32xf32> to vector<1x32xf32>
    %485 = arith.addf %403, %484 : vector<1x32xf32>
    %cst_66 = arith.constant 0.000000e+00 : f32
    %486 = vector.broadcast %cst_66 : f32 to vector<8x32xf32>
    %487 = vector.extract_strided_slice %11 {offsets = [176, 0], sizes = [16, 32], strides = [1, 1]} : vector<256x32xf32> to vector<16x32xf32>
    %cst_67 = arith.constant dense<0.000000e+00> : vector<24x32xf32>
    %488 = tpu.matmul %12, %487, %cst_67 {dimension_numbers = #tpu.dot_dimension_numbers<[1], [0], [0], [1], [0, 0, 1, 1], [], []>} : vector<24x16xf32>, vector<16x32xf32>, vector<24x32xf32> -> vector<24x32xf32>
    %489 = vector.extract_strided_slice %488 {offsets = [0, 0], sizes = [8, 32], strides = [1, 1]} : vector<24x32xf32> to vector<8x32xf32>
    %490 = vector.extract_strided_slice %13 {offsets = [0, 0], sizes = [1, 32], strides = [1, 1]} : vector<9x32xf32> to vector<1x32xf32>
    %491 = vector.shape_cast %490 : vector<1x32xf32> to vector<32xf32>
    %492 = vector.shape_cast %491 : vector<32xf32> to vector<1x32xf32>
    %493 = vector.broadcast %492 : vector<1x32xf32> to vector<8x32xf32>
    %494 = arith.mulf %489, %493 : vector<8x32xf32>
    %495 = arith.addf %486, %494 : vector<8x32xf32>
    %496 = vector.extract_strided_slice %488 {offsets = [8, 0], sizes = [8, 32], strides = [1, 1]} : vector<24x32xf32> to vector<8x32xf32>
    %497 = vector.extract_strided_slice %13 {offsets = [1, 0], sizes = [1, 32], strides = [1, 1]} : vector<9x32xf32> to vector<1x32xf32>
    %498 = vector.shape_cast %497 : vector<1x32xf32> to vector<32xf32>
    %499 = vector.shape_cast %498 : vector<32xf32> to vector<1x32xf32>
    %500 = vector.broadcast %499 : vector<1x32xf32> to vector<8x32xf32>
    %501 = arith.mulf %496, %500 : vector<8x32xf32>
    %502 = arith.addf %495, %501 : vector<8x32xf32>
    %503 = vector.extract_strided_slice %488 {offsets = [16, 0], sizes = [8, 32], strides = [1, 1]} : vector<24x32xf32> to vector<8x32xf32>
    %504 = vector.extract_strided_slice %13 {offsets = [2, 0], sizes = [1, 32], strides = [1, 1]} : vector<9x32xf32> to vector<1x32xf32>
    %505 = vector.shape_cast %504 : vector<1x32xf32> to vector<32xf32>
    %506 = vector.shape_cast %505 : vector<32xf32> to vector<1x32xf32>
    %507 = vector.broadcast %506 : vector<1x32xf32> to vector<8x32xf32>
    %508 = arith.mulf %503, %507 : vector<8x32xf32>
    %509 = arith.addf %502, %508 : vector<8x32xf32>
    %510 = vector.extract_strided_slice %11 {offsets = [192, 0], sizes = [16, 32], strides = [1, 1]} : vector<256x32xf32> to vector<16x32xf32>
    %cst_68 = arith.constant dense<0.000000e+00> : vector<24x32xf32>
    %511 = tpu.matmul %12, %510, %cst_68 {dimension_numbers = #tpu.dot_dimension_numbers<[1], [0], [0], [1], [0, 0, 1, 1], [], []>} : vector<24x16xf32>, vector<16x32xf32>, vector<24x32xf32> -> vector<24x32xf32>
    %512 = vector.extract_strided_slice %511 {offsets = [0, 0], sizes = [8, 32], strides = [1, 1]} : vector<24x32xf32> to vector<8x32xf32>
    %513 = vector.extract_strided_slice %13 {offsets = [3, 0], sizes = [1, 32], strides = [1, 1]} : vector<9x32xf32> to vector<1x32xf32>
    %514 = vector.shape_cast %513 : vector<1x32xf32> to vector<32xf32>
    %515 = vector.shape_cast %514 : vector<32xf32> to vector<1x32xf32>
    %516 = vector.broadcast %515 : vector<1x32xf32> to vector<8x32xf32>
    %517 = arith.mulf %512, %516 : vector<8x32xf32>
    %518 = arith.addf %509, %517 : vector<8x32xf32>
    %519 = vector.extract_strided_slice %511 {offsets = [8, 0], sizes = [8, 32], strides = [1, 1]} : vector<24x32xf32> to vector<8x32xf32>
    %520 = vector.extract_strided_slice %13 {offsets = [4, 0], sizes = [1, 32], strides = [1, 1]} : vector<9x32xf32> to vector<1x32xf32>
    %521 = vector.shape_cast %520 : vector<1x32xf32> to vector<32xf32>
    %522 = vector.shape_cast %521 : vector<32xf32> to vector<1x32xf32>
    %523 = vector.broadcast %522 : vector<1x32xf32> to vector<8x32xf32>
    %524 = arith.mulf %519, %523 : vector<8x32xf32>
    %525 = arith.addf %518, %524 : vector<8x32xf32>
    %526 = vector.extract_strided_slice %511 {offsets = [16, 0], sizes = [8, 32], strides = [1, 1]} : vector<24x32xf32> to vector<8x32xf32>
    %527 = vector.extract_strided_slice %13 {offsets = [5, 0], sizes = [1, 32], strides = [1, 1]} : vector<9x32xf32> to vector<1x32xf32>
    %528 = vector.shape_cast %527 : vector<1x32xf32> to vector<32xf32>
    %529 = vector.shape_cast %528 : vector<32xf32> to vector<1x32xf32>
    %530 = vector.broadcast %529 : vector<1x32xf32> to vector<8x32xf32>
    %531 = arith.mulf %526, %530 : vector<8x32xf32>
    %532 = arith.addf %525, %531 : vector<8x32xf32>
    %533 = vector.extract_strided_slice %11 {offsets = [208, 0], sizes = [16, 32], strides = [1, 1]} : vector<256x32xf32> to vector<16x32xf32>
    %cst_69 = arith.constant dense<0.000000e+00> : vector<24x32xf32>
    %534 = tpu.matmul %12, %533, %cst_69 {dimension_numbers = #tpu.dot_dimension_numbers<[1], [0], [0], [1], [0, 0, 1, 1], [], []>} : vector<24x16xf32>, vector<16x32xf32>, vector<24x32xf32> -> vector<24x32xf32>
    %535 = vector.extract_strided_slice %534 {offsets = [0, 0], sizes = [8, 32], strides = [1, 1]} : vector<24x32xf32> to vector<8x32xf32>
    %536 = vector.extract_strided_slice %13 {offsets = [6, 0], sizes = [1, 32], strides = [1, 1]} : vector<9x32xf32> to vector<1x32xf32>
    %537 = vector.shape_cast %536 : vector<1x32xf32> to vector<32xf32>
    %538 = vector.shape_cast %537 : vector<32xf32> to vector<1x32xf32>
    %539 = vector.broadcast %538 : vector<1x32xf32> to vector<8x32xf32>
    %540 = arith.mulf %535, %539 : vector<8x32xf32>
    %541 = arith.addf %532, %540 : vector<8x32xf32>
    %542 = vector.extract_strided_slice %534 {offsets = [8, 0], sizes = [8, 32], strides = [1, 1]} : vector<24x32xf32> to vector<8x32xf32>
    %543 = vector.extract_strided_slice %13 {offsets = [7, 0], sizes = [1, 32], strides = [1, 1]} : vector<9x32xf32> to vector<1x32xf32>
    %544 = vector.shape_cast %543 : vector<1x32xf32> to vector<32xf32>
    %545 = vector.shape_cast %544 : vector<32xf32> to vector<1x32xf32>
    %546 = vector.broadcast %545 : vector<1x32xf32> to vector<8x32xf32>
    %547 = arith.mulf %542, %546 : vector<8x32xf32>
    %548 = arith.addf %541, %547 : vector<8x32xf32>
    %549 = vector.extract_strided_slice %534 {offsets = [16, 0], sizes = [8, 32], strides = [1, 1]} : vector<24x32xf32> to vector<8x32xf32>
    %550 = vector.extract_strided_slice %13 {offsets = [8, 0], sizes = [1, 32], strides = [1, 1]} : vector<9x32xf32> to vector<1x32xf32>
    %551 = vector.shape_cast %550 : vector<1x32xf32> to vector<32xf32>
    %552 = vector.shape_cast %551 : vector<32xf32> to vector<1x32xf32>
    %553 = vector.broadcast %552 : vector<1x32xf32> to vector<8x32xf32>
    %554 = arith.mulf %549, %553 : vector<8x32xf32>
    %555 = arith.addf %548, %554 : vector<8x32xf32>
    %556 = vector.broadcast %14 : vector<1x32xf32> to vector<8x32xf32>
    %557 = arith.mulf %555, %556 : vector<8x32xf32>
    %558 = vector.broadcast %15 : vector<1x32xf32> to vector<8x32xf32>
    %559 = arith.addf %557, %558 : vector<8x32xf32>
    %cst_70 = arith.constant 0.000000e+00 : f32
    %560 = vector.broadcast %cst_70 : f32 to vector<8x32xf32>
    %561 = arith.maximumf %559, %560 : vector<8x32xf32>
    %c0_71 = arith.constant 0 : index
    %c48 = arith.constant 48 : index
    %c0_72 = arith.constant 0 : index
    %562 = vector.load %arg9[%c0_71, %c48, %c0_72] : memref<1x64x32xf32, #tpu.memory_space<vmem>>, vector<1x8x32xf32>
    %563 = vector.shape_cast %562 : vector<1x8x32xf32> to vector<8x32xf32>
    %564 = vector.shape_cast %561 : vector<8x32xf32> to vector<1x8x32xf32>
    tpu.vector_store %arg9[%c0_71, %c48, %c0_72], %564 {strides = array<i32>} : memref<1x64x32xf32, #tpu.memory_space<vmem>>, vector<1x8x32xf32>,
    %cst_73 = arith.constant dense<0.000000e+00> : vector<32xf32>
    %565 = vector.multi_reduction <add>, %561, %cst_73 [0] : vector<8x32xf32> to vector<32xf32>
    %566 = vector.shape_cast %565 : vector<32xf32> to vector<1x32xf32>
    %567 = arith.addf %485, %566 : vector<1x32xf32>
    %cst_74 = arith.constant 0.000000e+00 : f32
    %568 = vector.broadcast %cst_74 : f32 to vector<8x32xf32>
    %569 = vector.extract_strided_slice %11 {offsets = [208, 0], sizes = [16, 32], strides = [1, 1]} : vector<256x32xf32> to vector<16x32xf32>
    %cst_75 = arith.constant dense<0.000000e+00> : vector<24x32xf32>
    %570 = tpu.matmul %12, %569, %cst_75 {dimension_numbers = #tpu.dot_dimension_numbers<[1], [0], [0], [1], [0, 0, 1, 1], [], []>} : vector<24x16xf32>, vector<16x32xf32>, vector<24x32xf32> -> vector<24x32xf32>
    %571 = vector.extract_strided_slice %570 {offsets = [0, 0], sizes = [8, 32], strides = [1, 1]} : vector<24x32xf32> to vector<8x32xf32>
    %572 = vector.extract_strided_slice %13 {offsets = [0, 0], sizes = [1, 32], strides = [1, 1]} : vector<9x32xf32> to vector<1x32xf32>
    %573 = vector.shape_cast %572 : vector<1x32xf32> to vector<32xf32>
    %574 = vector.shape_cast %573 : vector<32xf32> to vector<1x32xf32>
    %575 = vector.broadcast %574 : vector<1x32xf32> to vector<8x32xf32>
    %576 = arith.mulf %571, %575 : vector<8x32xf32>
    %577 = arith.addf %568, %576 : vector<8x32xf32>
    %578 = vector.extract_strided_slice %570 {offsets = [8, 0], sizes = [8, 32], strides = [1, 1]} : vector<24x32xf32> to vector<8x32xf32>
    %579 = vector.extract_strided_slice %13 {offsets = [1, 0], sizes = [1, 32], strides = [1, 1]} : vector<9x32xf32> to vector<1x32xf32>
    %580 = vector.shape_cast %579 : vector<1x32xf32> to vector<32xf32>
    %581 = vector.shape_cast %580 : vector<32xf32> to vector<1x32xf32>
    %582 = vector.broadcast %581 : vector<1x32xf32> to vector<8x32xf32>
    %583 = arith.mulf %578, %582 : vector<8x32xf32>
    %584 = arith.addf %577, %583 : vector<8x32xf32>
    %585 = vector.extract_strided_slice %570 {offsets = [16, 0], sizes = [8, 32], strides = [1, 1]} : vector<24x32xf32> to vector<8x32xf32>
    %586 = vector.extract_strided_slice %13 {offsets = [2, 0], sizes = [1, 32], strides = [1, 1]} : vector<9x32xf32> to vector<1x32xf32>
    %587 = vector.shape_cast %586 : vector<1x32xf32> to vector<32xf32>
    %588 = vector.shape_cast %587 : vector<32xf32> to vector<1x32xf32>
    %589 = vector.broadcast %588 : vector<1x32xf32> to vector<8x32xf32>
    %590 = arith.mulf %585, %589 : vector<8x32xf32>
    %591 = arith.addf %584, %590 : vector<8x32xf32>
    %592 = vector.extract_strided_slice %11 {offsets = [224, 0], sizes = [16, 32], strides = [1, 1]} : vector<256x32xf32> to vector<16x32xf32>
    %cst_76 = arith.constant dense<0.000000e+00> : vector<24x32xf32>
    %593 = tpu.matmul %12, %592, %cst_76 {dimension_numbers = #tpu.dot_dimension_numbers<[1], [0], [0], [1], [0, 0, 1, 1], [], []>} : vector<24x16xf32>, vector<16x32xf32>, vector<24x32xf32> -> vector<24x32xf32>
    %594 = vector.extract_strided_slice %593 {offsets = [0, 0], sizes = [8, 32], strides = [1, 1]} : vector<24x32xf32> to vector<8x32xf32>
    %595 = vector.extract_strided_slice %13 {offsets = [3, 0], sizes = [1, 32], strides = [1, 1]} : vector<9x32xf32> to vector<1x32xf32>
    %596 = vector.shape_cast %595 : vector<1x32xf32> to vector<32xf32>
    %597 = vector.shape_cast %596 : vector<32xf32> to vector<1x32xf32>
    %598 = vector.broadcast %597 : vector<1x32xf32> to vector<8x32xf32>
    %599 = arith.mulf %594, %598 : vector<8x32xf32>
    %600 = arith.addf %591, %599 : vector<8x32xf32>
    %601 = vector.extract_strided_slice %593 {offsets = [8, 0], sizes = [8, 32], strides = [1, 1]} : vector<24x32xf32> to vector<8x32xf32>
    %602 = vector.extract_strided_slice %13 {offsets = [4, 0], sizes = [1, 32], strides = [1, 1]} : vector<9x32xf32> to vector<1x32xf32>
    %603 = vector.shape_cast %602 : vector<1x32xf32> to vector<32xf32>
    %604 = vector.shape_cast %603 : vector<32xf32> to vector<1x32xf32>
    %605 = vector.broadcast %604 : vector<1x32xf32> to vector<8x32xf32>
    %606 = arith.mulf %601, %605 : vector<8x32xf32>
    %607 = arith.addf %600, %606 : vector<8x32xf32>
    %608 = vector.extract_strided_slice %593 {offsets = [16, 0], sizes = [8, 32], strides = [1, 1]} : vector<24x32xf32> to vector<8x32xf32>
    %609 = vector.extract_strided_slice %13 {offsets = [5, 0], sizes = [1, 32], strides = [1, 1]} : vector<9x32xf32> to vector<1x32xf32>
    %610 = vector.shape_cast %609 : vector<1x32xf32> to vector<32xf32>
    %611 = vector.shape_cast %610 : vector<32xf32> to vector<1x32xf32>
    %612 = vector.broadcast %611 : vector<1x32xf32> to vector<8x32xf32>
    %613 = arith.mulf %608, %612 : vector<8x32xf32>
    %614 = arith.addf %607, %613 : vector<8x32xf32>
    %615 = vector.extract_strided_slice %11 {offsets = [240, 0], sizes = [16, 32], strides = [1, 1]} : vector<256x32xf32> to vector<16x32xf32>
    %cst_77 = arith.constant dense<0.000000e+00> : vector<24x32xf32>
    %616 = tpu.matmul %12, %615, %cst_77 {dimension_numbers = #tpu.dot_dimension_numbers<[1], [0], [0], [1], [0, 0, 1, 1], [], []>} : vector<24x16xf32>, vector<16x32xf32>, vector<24x32xf32> -> vector<24x32xf32>
    %617 = vector.extract_strided_slice %616 {offsets = [0, 0], sizes = [8, 32], strides = [1, 1]} : vector<24x32xf32> to vector<8x32xf32>
    %618 = vector.extract_strided_slice %13 {offsets = [6, 0], sizes = [1, 32], strides = [1, 1]} : vector<9x32xf32> to vector<1x32xf32>
    %619 = vector.shape_cast %618 : vector<1x32xf32> to vector<32xf32>
    %620 = vector.shape_cast %619 : vector<32xf32> to vector<1x32xf32>
    %621 = vector.broadcast %620 : vector<1x32xf32> to vector<8x32xf32>
    %622 = arith.mulf %617, %621 : vector<8x32xf32>
    %623 = arith.addf %614, %622 : vector<8x32xf32>
    %624 = vector.extract_strided_slice %616 {offsets = [8, 0], sizes = [8, 32], strides = [1, 1]} : vector<24x32xf32> to vector<8x32xf32>
    %625 = vector.extract_strided_slice %13 {offsets = [7, 0], sizes = [1, 32], strides = [1, 1]} : vector<9x32xf32> to vector<1x32xf32>
    %626 = vector.shape_cast %625 : vector<1x32xf32> to vector<32xf32>
    %627 = vector.shape_cast %626 : vector<32xf32> to vector<1x32xf32>
    %628 = vector.broadcast %627 : vector<1x32xf32> to vector<8x32xf32>
    %629 = arith.mulf %624, %628 : vector<8x32xf32>
    %630 = arith.addf %623, %629 : vector<8x32xf32>
    %631 = vector.extract_strided_slice %616 {offsets = [16, 0], sizes = [8, 32], strides = [1, 1]} : vector<24x32xf32> to vector<8x32xf32>
    %632 = vector.extract_strided_slice %13 {offsets = [8, 0], sizes = [1, 32], strides = [1, 1]} : vector<9x32xf32> to vector<1x32xf32>
    %633 = vector.shape_cast %632 : vector<1x32xf32> to vector<32xf32>
    %634 = vector.shape_cast %633 : vector<32xf32> to vector<1x32xf32>
    %635 = vector.broadcast %634 : vector<1x32xf32> to vector<8x32xf32>
    %636 = arith.mulf %631, %635 : vector<8x32xf32>
    %637 = arith.addf %630, %636 : vector<8x32xf32>
    %638 = vector.broadcast %14 : vector<1x32xf32> to vector<8x32xf32>
    %639 = arith.mulf %637, %638 : vector<8x32xf32>
    %640 = vector.broadcast %15 : vector<1x32xf32> to vector<8x32xf32>
    %641 = arith.addf %639, %640 : vector<8x32xf32>
    %cst_78 = arith.constant 0.000000e+00 : f32
    %642 = vector.broadcast %cst_78 : f32 to vector<8x32xf32>
    %643 = arith.maximumf %641, %642 : vector<8x32xf32>
    %c0_79 = arith.constant 0 : index
    %c56 = arith.constant 56 : index
    %c0_80 = arith.constant 0 : index
    %644 = vector.load %arg9[%c0_79, %c56, %c0_80] : memref<1x64x32xf32, #tpu.memory_space<vmem>>, vector<1x8x32xf32>
    %645 = vector.shape_cast %644 : vector<1x8x32xf32> to vector<8x32xf32>
    %646 = vector.shape_cast %643 : vector<8x32xf32> to vector<1x8x32xf32>
    tpu.vector_store %arg9[%c0_79, %c56, %c0_80], %646 {strides = array<i32>} : memref<1x64x32xf32, #tpu.memory_space<vmem>>, vector<1x8x32xf32>,
    %cst_81 = arith.constant dense<0.000000e+00> : vector<32xf32>
    %647 = vector.multi_reduction <add>, %643, %cst_81 [0] : vector<8x32xf32> to vector<32xf32>
    %648 = vector.shape_cast %647 : vector<32xf32> to vector<1x32xf32>
    %649 = arith.addf %567, %648 : vector<1x32xf32>
    %cst_82 = arith.constant 1.562500e-02 : f32
    %650 = vector.broadcast %cst_82 : f32 to vector<1x32xf32>
    %651 = arith.mulf %649, %650 : vector<1x32xf32>
    %c0_83 = arith.constant 0 : index
    %c0_84 = arith.constant 0 : index
    %c0_85 = arith.constant 0 : index
    %652 = vector.load %arg10[%c0_83, %c0_84, %c0_85] : memref<1x1x32xf32, #tpu.memory_space<vmem>>, vector<1x1x32xf32>
    %653 = vector.shape_cast %652 : vector<1x1x32xf32> to vector<1x32xf32>
    %654 = vector.shape_cast %651 : vector<1x32xf32> to vector<1x1x32xf32>
    tpu.vector_store %arg10[%c0_83, %c0_84, %c0_85], %654 {strides = array<i32>} : memref<1x1x32xf32, #tpu.memory_space<vmem>>, vector<1x1x32xf32>,
    return
  }
  func.func @transform_0(%arg0: i32) -> (i32, i32, i32) {
    %c0_i32 = arith.constant 0 : i32
    %c0_i32_0 = arith.constant 0 : i32
    %c0_i32_1 = arith.constant 0 : i32
    return %arg0, %c0_i32, %c0_i32_0 : i32, i32, i32
  }
  func.func @transform_1(%arg0: i32) -> (i32, i32) {
    %c0_i32 = arith.constant 0 : i32
    %c0_i32_0 = arith.constant 0 : i32
    %c0_i32_1 = arith.constant 0 : i32
    return %c0_i32, %c0_i32_0 : i32, i32
  }
  func.func @transform_2(%arg0: i32) -> (i32, i32) {
    %c0_i32 = arith.constant 0 : i32
    %c0_i32_0 = arith.constant 0 : i32
    %c0_i32_1 = arith.constant 0 : i32
    return %c0_i32, %c0_i32_0 : i32, i32
  }
  func.func @transform_3(%arg0: i32) -> (i32, i32) {
    %c0_i32 = arith.constant 0 : i32
    %c0_i32_0 = arith.constant 0 : i32
    %c0_i32_1 = arith.constant 0 : i32
    return %c0_i32, %c0_i32_0 : i32, i32
  }
  func.func @transform_4(%arg0: i32) -> (i32, i32) {
    %c0_i32 = arith.constant 0 : i32
    %c0_i32_0 = arith.constant 0 : i32
    %c0_i32_1 = arith.constant 0 : i32
    return %c0_i32, %c0_i32_0 : i32, i32
  }
  func.func @transform_5(%arg0: i32) -> (i32, i32) {
    %c0_i32 = arith.constant 0 : i32
    %c0_i32_0 = arith.constant 0 : i32
    %c0_i32_1 = arith.constant 0 : i32
    return %c0_i32, %c0_i32_0 : i32, i32
  }
  func.func @transform_6(%arg0: i32) -> (i32, i32) {
    %c0_i32 = arith.constant 0 : i32
    %c0_i32_0 = arith.constant 0 : i32
    %c0_i32_1 = arith.constant 0 : i32
    return %c0_i32, %c0_i32_0 : i32, i32
  }
  func.func @transform_7(%arg0: i32) -> (i32, i32) {
    %c0_i32 = arith.constant 0 : i32
    %c0_i32_0 = arith.constant 0 : i32
    %c0_i32_1 = arith.constant 0 : i32
    return %c0_i32, %c0_i32_0 : i32, i32
  }
  func.func @transform_8(%arg0: i32) -> (i32, i32, i32) {
    %c0_i32 = arith.constant 0 : i32
    %c0_i32_0 = arith.constant 0 : i32
    %c0_i32_1 = arith.constant 0 : i32
    return %arg0, %c0_i32, %c0_i32_0 : i32, i32, i32
  }
  func.func @transform_9(%arg0: i32) -> (i32, i32, i32) {
    %c0_i32 = arith.constant 0 : i32
    %c0_i32_0 = arith.constant 0 : i32
    %c0_i32_1 = arith.constant 0 : i32
    return %arg0, %c0_i32, %c0_i32_0 : i32, i32, i32
  }
}

</mosaic_0001>

<bundles_post_ra>
// kernel: tpu_custom_call.1
= control target key start
LH: loop header
LB: loop body
LE: loop exit
PB: predicated region body
PF: predicated region fallthrough
CT: control target
= control target key end

     0   :  { %15 = vsyncpa [#allocation3], 0  ;;  %s3861_s0 = inlined_call_operand.vmem [shape: f32[2,256,4], index: 0, kind: input, shape index: {}]   ;;  %s3862_s1 = inlined_call_operand.vmem [shape: f32[4,32], index: 1, kind: input, shape index: {}]   ;;  %s3863_s2 = inlined_call_operand.vmem [shape: f32[1,32], index: 2, kind: input, shape index: {}]   ;;  %s3864_s3 = inlined_call_operand.vmem [shape: f32[1,32], index: 3, kind: input, shape index: {}]   ;;  %s3865_s4 = inlined_call_operand.vmem [shape: f32[24,16], index: 4, kind: input, shape index: {}]   ;;  %s3866_s5 = inlined_call_operand.vmem [shape: f32[9,32], index: 5, kind: input, shape index: {}]   ;;  %s3867_s6 = inlined_call_operand.vmem [shape: f32[1,32], index: 6, kind: input, shape index: {}]   ;;  %s3868_s7 = inlined_call_operand.vmem [shape: f32[1,32], index: 7, kind: input, shape index: {}]   ;;  %s3869_s8 = inlined_call_operand.vmem [shape: f32[2,64,32], index: 8, kind: output, shape index: {0}]   ;;  %s3870_s9 = inlined_call_operand.hbm [shape: f32[2,1,32], index: 9, kind: output, shape index: {1}]  }
   0x1   :  { %17 = vsyncpa [#allocation3 + $0x1], 0  ;;  %s3176_s30 = smov 0   ;;  %s3178_s10 = smov 0  }
   0x2   :  { %s3180_s11 = smov 0   ;;  %s3182_s12 = smov 0  }
   0x3 LB: > { %s3197_s13 = sadd.s32 4294967295, %s3120_s12   ;;  %s2496_s14 = sadd.s32 4294967294, %s3120_s12   ;;  %s3120_s12 = sphi %s3182_s12, %s3876_s12   ;;  %s3116_s11 = sphi %s3180_s11, %s3875_s11   ;;  %s3112_s10 = sphi %s3178_s10, %s3874_s10   ;;  %s3108_s30 = sphi %s3176_s30, %s3873_s30  }
   0x4   : > { %s3201_s15 = sadd.s32 1, %s3120_s12   ;;  %s229_s16 = sadd.s32 1, %s3116_s11 }
   0x5   : > { %s226_s17 = ssub.s32 %s3120_s12, %s3201_s15  ;;  %p239_p0 = scmp.ne.s32.totalorder %s3116_s11, %s3112_s10 }
   0x6   : > { %p227_p1 = scmp.eq.s32.totalorder %s226_s17, 0  ;;  %p240_p2 = scmp.eq.s32.totalorder %s3197_s13, 1 }
   0x7   : > { %p245_p3 = scmp.ne.s32.totalorder %s3112_s10, %s3108_s30  ;;  %p246_p4 = scmp.eq.s32.totalorder %s2496_s14, 1 }
   0x8   : > { %s3212_s18 = scalar_select %p227_p1, %s3116_s11, %s229_s16  }
   0x9   : > { %p3214_p5 = por %p240_p2, %p239_p0  ;;  %p3218_p6 = por %p246_p4, %p245_p3 }
   0xa   : > { %p2499_p7 = scmp.ge.s32.totalorder %s3120_s12, 1  ;;  %p293_p8 = scmp.lt.s32.totalorder %s3120_s12, 3 }
   0xc   : > { %p294_p9 = pnand %p2499_p7, %p293_p8 }
   0xd   : > { %v375_v0 = vld [vmem:[%s3862_s1] sm:$0xf] (!%p294_p9)  ;;  %vm473_vm0 = vcmask (!%p294_p9), 1043456   ;;  %p333_p10 = scmp.lt.s32.totalorder (!%p294_p9), %s3197_s13, 1  ;;  %vm376_vm1 = vcmask (!%p294_p9), 31744   ;;  %v3122_v33 = vmov (!%p294_p9), 0.0|0.0  }
   0xe   : > { %297 = sbr.rel (%p294_p9) target bundleno = 628 (0x274), region = 52  ;;  %2708 = vmatprep.subr.msk.mxu0 (!%p294_p9), %vm473_vm0, %v375_v0  ;;  %3014 = vmatprep.subr.bf16.mxu1 (!%p294_p9), %v3122_v33  ;;  %vm3123_vm2 = vmmov (!%p294_p9), 0   ;;  %v3124_v34 = vmov (!%p294_p9), 0.0   ;;  %v3310_v35 = vld [vmem:[%s3863_s2] ss:$0 sm:$0xff] (!%p294_p9)  ;;  %v3329_v57 = vld [vmem:[%s3865_s4 + $0x8] sm:$0xff] (!%p294_p9) }
   0xf   : > { %2709 = vmatpush3.msk.msra.mxu0 (!%p294_p9), %vm473_vm0, %v375_v0  ;;  %2765 = vmatprep.mubr.msk.f32.mxu1 (!%p294_p9), %vm3123_vm2, %v3124_v34  ;;  %v3315_v37 = vld [vmem:[%s3864_s3] ss:$0 sm:$0xff] (!%p294_p9)  ;;  %vm819_vm3 = vcmask (!%p294_p9), 130048   ;;  %vm1040_vm4 = vcmask (!%p294_p9), 261120   ;;  %s2590_s28 = sshll.u32 (!%p294_p9), %s3197_s13, 4  ;;  %vm2393_vm5 = vcmask (!%p294_p9), 253952  }
  0x10   : > { %2966 = vmatprep.subr.bf16.mxu0 (!%p294_p9), %v3122_v33  ;;  %v3335_v59 = vld [vmem:[%s3865_s4] sm:$0xff] (!%p294_p9)  ;;  %s3819_s21 = scalar_lea.hbm (!%p294_p9), %s3870_s9, %s2590_s28 }
  0x15   : > { %s3229_s23 = scalar_select %p333_p10, %s3197_s13, 1 }
  0x16   : > { %s3125_s13 = smov [#allocation2]  }
  0x17   : > { %s2593_s24 = sshll.u32 %s3229_s23, 8  ;;  %s3062_s25 = sshll.u32 %s3125_s13, 4  ;;  %s3063_s25 = int_to_ptr.vmem [resolvable:$false] %s3062_s25 }
  0x18   : > { %s3235_s27 = scalar_lea.vmem %s3861_s0, %s2593_s24  ;;  %s2594_s24 = sshll.u32 %s3229_s23, 6 }
  0x19   : > { %v343_v1 = vld [vmem:[%s3235_s27] sm:$0xff]  ;;  %v344_v2 = vld [vmem:[%s3235_s27 + $0x8] sm:$0xff]  ;;  %v345_v3 = vld [vmem:[%s3235_s27 + $0x10] sm:$0xff]  ;;  %s331_s23 = sand.u32 1, %s3112_s10   ;;  %s3064_s26 = scalar_lea.vmem %s3063_s25, 32 }
  0x1a   : > { %2710 = vmatprep.mubr.msk.f32.mxu0 %vm376_vm1, %v343_v1  ;;  %v346_v4 = vld [vmem:[%s3235_s27 + $0x18] sm:$0xff]  ;;  %v347_v5 = vld [vmem:[%s3235_s27 + $0x20] sm:$0xff]  ;;  %v348_v6 = vld [vmem:[%s3235_s27 + $0x28] sm:$0xff]  ;;  %s332_s29 = scalar_lea.vmem [#allocation2], %s331_s23  ;;  %s2401_s22 = scalar_lea.sflag [#allocation3], %s331_s23 }
  0x1b   : > { %2711 = vmatmul.mubr.msk.f32.vlgmr.msra.gmra.mrb[0].mxu0 %vm376_vm1, %v344_v2  ;;  %v349_v7 = vld [vmem:[%s3235_s27 + $0x30] sm:$0xff]  ;;  %v350_v8 = vld [vmem:[%s3235_s27 + $0x38] sm:$0xff]  ;;  %v351_v9 = vld [vmem:[%s3235_s27 + $0x40] sm:$0xff]  ;;  %s2416_s14 = sshll.u32 %s332_s29, 4  ;;  %s3821_s14 = int_to_ptr.vmem [resolvable:$true] %s2416_s14 }
  0x1c   : > { %2713 = vmatprep.mubr.msk.f32.mxu0 %vm376_vm1, %v345_v3  ;;  %v352_v10 = vld [vmem:[%s3235_s27 + $0x48] sm:$0xff]  ;;  %v353_v11 = vld [vmem:[%s3235_s27 + $0x50] sm:$0xff]  ;;  %v354_v12 = vld [vmem:[%s3235_s27 + $0x58] sm:$0xff]  ;;  %p3065_p0 = scmp.lt.s32.totalorder %s3821_s14, %s3063_s25 }
  0x1d   : > { %v355_v13 = vld [vmem:[%s3235_s27 + $0x60] sm:$0xff]  ;;  %v356_v14 = vld [vmem:[%s3235_s27 + $0x68] sm:$0xff]  ;;  %v357_v15 = vld [vmem:[%s3235_s27 + $0x70] sm:$0xff] }
  0x1e   : > { %v358_v16 = vld [vmem:[%s3235_s27 + $0x78] sm:$0xff]  ;;  %v359_v17 = vld [vmem:[%s3235_s27 + $0x80] sm:$0xff]  ;;  %v360_v18 = vld [vmem:[%s3235_s27 + $0x88] sm:$0xff] }
  0x1f   : > { %2714 = vmatmul.mubr.msk.f32.gmra.mrb[2].mxu0 %vm376_vm1, %v346_v4  ;;  %v361_v19 = vld [vmem:[%s3235_s27 + $0x90] sm:$0xff]  ;;  %v362_v20 = vld [vmem:[%s3235_s27 + $0x98] sm:$0xff]  ;;  %v363_v21 = vld [vmem:[%s3235_s27 + $0xa0] sm:$0xff] }
  0x20   : > { %2716 = vmatprep.mubr.msk.f32.mxu0 %vm376_vm1, %v347_v5  ;;  %v364_v22 = vld [vmem:[%s3235_s27 + $0xa8] sm:$0xff]  ;;  %v365_v23 = vld [vmem:[%s3235_s27 + $0xb0] sm:$0xff]  ;;  %v366_v24 = vld [vmem:[%s3235_s27 + $0xb8] sm:$0xff] }
  0x21   : > { %v367_v25 = vld [vmem:[%s3235_s27 + $0xc0] sm:$0xff]  ;;  %v368_v26 = vld [vmem:[%s3235_s27 + $0xc8] sm:$0xff]  ;;  %v369_v27 = vld [vmem:[%s3235_s27 + $0xd0] sm:$0xff] }
  0x22   : > { %v370_v28 = vld [vmem:[%s3235_s27 + $0xd8] sm:$0xff]  ;;  %v371_v29 = vld [vmem:[%s3235_s27 + $0xe0] sm:$0xff]  ;;  %v372_v30 = vld [vmem:[%s3235_s27 + $0xe8] sm:$0xff] }
  0x23   : > { %2717 = vmatmul.mubr.msk.f32.gmra.mrb[4].mxu0 %vm376_vm1, %v348_v6  ;;  %v373_v31 = vld [vmem:[%s3235_s27 + $0xf0] sm:$0xff]  ;;  %v374_v32 = vld [vmem:[%s3235_s27 + $0xf8] sm:$0xff]  ;;  %s3667_s27 = scalar_lea.vmem %s3869_s8, %s2594_s24  ;;  %s3058_s24 = scalar_lea.vmem %s3821_s14, 16 }
  0x24   : > { %2719 = vmatprep.mubr.msk.f32.mxu0 %vm376_vm1, %v349_v7  ;;  %v3351_v4 = vld [vmem:[%s3865_s4 + $0x10] sm:$0xff]  ;;  %p3059_p11 = scmp.ne.s32.totalorder %s3821_s14, %s3058_s24  ;;  %p3066_p1 = scmp.lt.s32.totalorder %s3064_s26, %s3058_s24 }
  0x26   : > { %p3060_p12 = pnand %p3059_p11, %p3214_p5  ;;  %p3067_p2 = por %p3066_p1, %p3065_p0 }
  0x27   : > { %2720 = vmatmul.mubr.msk.f32.gmra.mrb[6].mxu0 %vm376_vm1, %v350_v8 }
  0x28   : > { %2722 = vmatprep.mubr.msk.f32.mxu0 %vm376_vm1, %v351_v9  ;;  %p3061_p13 = pneg %p3060_p12 }
  0x2a   : > { %p3068_p3 = pnand %p3067_p2, %p3061_p13 }
  0x2b   : > { %2723 = vmatmul.mubr.msk.f32.gmra.mrb[8].mxu0 %vm376_vm1, %v352_v10 }
  0x2c   : > { %2725 = vmatprep.mubr.msk.f32.mxu0 %vm376_vm1, %v353_v11 }
  0x2f   : > { %2726 = vmatmul.mubr.msk.f32.gmra.mrb[10].mxu0 %vm376_vm1, %v354_v12 }
  0x30   : > { %2728 = vmatprep.mubr.msk.f32.mxu0 %vm376_vm1, %v355_v13 }
  0x33   : > { %2729 = vmatmul.mubr.msk.f32.gmra.mrb[12].mxu0 %vm376_vm1, %v356_v14 }
  0x34   : > { %2731 = vmatprep.mubr.msk.f32.mxu0 %vm376_vm1, %v357_v15 }
  0x37   : > { %2732 = vmatmul.mubr.msk.f32.gmra.mrb[14].mxu0 %vm376_vm1, %v358_v16 }
  0x38   : > { %2734 = vmatprep.mubr.msk.f32.mxu0 %vm376_vm1, %v359_v17 }
  0x3b   : > { %2735 = vmatmul.mubr.msk.f32.gmra.mrb[16].mxu0 %vm376_vm1, %v360_v18 }
  0x3c   : > { %2737 = vmatprep.mubr.msk.f32.mxu0 %vm376_vm1, %v361_v19 }
  0x3f   : > { %2738 = vmatmul.mubr.msk.f32.gmra.mrb[18].mxu0 %vm376_vm1, %v362_v20 }
  0x40   : > { %2740 = vmatprep.mubr.msk.f32.mxu0 %vm376_vm1, %v363_v21 }
  0x43   : > { %2741 = vmatmul.mubr.msk.f32.gmra.mrb[20].mxu0 %vm376_vm1, %v364_v22 }
  0x44   : > { %2743 = vmatprep.mubr.msk.f32.mxu0 %vm376_vm1, %v365_v23 }
  0x47   : > { %2744 = vmatmul.mubr.msk.f32.gmra.mrb[22].mxu0 %vm376_vm1, %v366_v24 }
  0x48   : > { %2746 = vmatprep.mubr.msk.f32.mxu0 %vm376_vm1, %v367_v25 }
  0x4b   : > { %2747 = vmatmul.mubr.msk.f32.gmra.mrb[24].mxu0 %vm376_vm1, %v368_v26 }
  0x4c   : > { %2749 = vmatprep.mubr.msk.f32.mxu0 %vm376_vm1, %v369_v27 }
  0x4f   : > { %2750 = vmatmul.mubr.msk.f32.gmra.mrb[26].mxu0 %vm376_vm1, %v370_v28 }
  0x50   : > { %2752 = vmatprep.mubr.msk.f32.mxu0 %vm376_vm1, %v371_v29 }
  0x53   : > { %2753 = vmatmul.mubr.msk.f32.gmra.mrb[28].mxu0 %vm376_vm1, %v372_v30 }
  0x54   : > { %2755 = vmatprep.mubr.msk.f32.mxu0 %vm376_vm1, %v373_v31 }
  0x57   : > { %2756 = vmatmul.mubr.msk.f32.gmra.mrb[30].mxu0 %vm376_vm1, %v374_v32 }
  0x58   : > { %2762 = vmatprep.mubr.msk.f32.mxu0 %vm3123_vm2, %v3124_v34 }
  0xee   : > { %v2712_v36 = vpop.f32.mrb[0].mxu0 }
  0xef   : > { %v710_v38 = vmul.f32 %v2712_v36, %v3310_v35  ;;  %v543_v39 = vpop.f32.mrb[1].mxu0 }
  0xf0   : > { %v709_v40 = vmul.f32 %v3310_v35, %v543_v39 }
  0xf1   : > { %v749_v41 = vadd.f32 %v3315_v37, %v710_v38 }
  0xf2   : > { %v748_v42 = vadd.f32 %v3315_v37, %v709_v40  ;;  %v2715_v43 = vpop.f32.mrb[2].mxu0 }
  0xf3   : > { %v781_v44 = vmax.f32 %v749_v41, 0.0  ;;  %v712_v45 = vmul.f32 %v2715_v43, %v3310_v35  ;;  %v553_v46 = vpop.f32.mrb[3].mxu0 }
  0xf4   : > { %v780_v47 = vmax.f32 %v748_v42, 0.0  ;;  %v711_v48 = vmul.f32 %v3310_v35, %v553_v46 }
  0xf5   : > { %v751_v49 = vadd.f32 %v3315_v37, %v712_v45 }
  0xf6   : > { %v2967_v50 = vpack.c.bf16 %v781_v44, %v780_v47  ;;  %v750_v51 = vadd.f32 %v3315_v37, %v711_v48  ;;  %v2718_v52 = vpop.f32.mrb[4].mxu0 }
  0xf7   : > { %v783_v53 = vmax.f32 %v751_v49, 0.0  ;;  %v714_v54 = vmul.f32 %v2718_v52, %v3310_v35  ;;  %v563_v55 = vpop.f32.mrb[5].mxu0 }
  0xf8   : > { %v782_v56 = vmax.f32 %v750_v51, 0.0  ;;  %2968 = vmatpush3.bf16.msra.mxu0 %v2967_v50  ;;  %3015 = vmatpush3.bf16.msra.mxu1 %v2967_v50  ;;  %v713_v58 = vmul.f32 %v3310_v35, %v563_v55 }
  0xf9   : > { %v753_v60 = vadd.f32 %v3315_v37, %v714_v54  ;;  %2969 = vmatprep.subr.bf16.mxu1 %v3122_v33  ;;  %2984 = vmatprep.subr.bf16.mxu0 %v3122_v33 }
  0xfa   : > { %v2970_v61 = vpack.c.bf16 %v783_v53, %v782_v56  ;;  %v752_v62 = vadd.f32 %v3315_v37, %v713_v58  ;;  %v2721_v63 = vpop.f32.mrb[6].mxu0 }
  0xfb   : > { %v785_v0 = vmax.f32 %v753_v60, 0.0  ;;  %2766 = vmatmul.mubr.msk.f32.vlgmr.msra.gmra.mrb[0].mxu1 %vm819_vm3, %v3329_v57  ;;  %2763 = vmatmul.mubr.msk.f32.vlgmr.msra.gmra.mrb[32].mxu0 %vm819_vm3, %v3335_v59  ;;  %v716_v1 = vmul.f32 %v2721_v63, %v3310_v35  ;;  %v573_v2 = vpop.f32.mrb[7].mxu0 }
  0xfc   : > { %v784_v3 = vmax.f32 %v752_v62, 0.0  ;;  %2971 = vmatpush3.bf16.msra.mxu1 %v2970_v61  ;;  %2768 = vmatprep.mubr.msk.f32.mxu1 %vm3123_vm2, %v3124_v34  ;;  %v715_v5 = vmul.f32 %v3310_v35, %v573_v2 }
  0xfd   : > { %2972 = vmatprep.subr.bf16.mxu1 %v3122_v33  ;;  %v755_v6 = vadd.f32 %v3315_v37, %v716_v1  ;;  %2840 = vmatprep.mubr.msk.f32.mxu0 %vm3123_vm2, %v3124_v34 }
  0xfe   : > { %v2973_v7 = vpack.c.bf16 %v785_v0, %v784_v3  ;;  %v754_v8 = vadd.f32 %v3315_v37, %v715_v5  ;;  %v2724_v9 = vpop.f32.mrb[8].mxu0 }
  0xff   : > { %2769 = vmatmul.mubr.msk.f32.gmra.mrb[2].mxu1 %vm819_vm3, %v3351_v4  ;;  %v787_v10 = vmax.f32 %v755_v6, 0.0  ;;  %v718_v11 = vmul.f32 %v2724_v9, %v3310_v35  ;;  %v583_v12 = vpop.f32.mrb[9].mxu0 }
 0x100   : > { %2775 = vmatprep.mubr.msk.f32.mxu1 %vm3123_vm2, %v3124_v34  ;;  %v786_v13 = vmax.f32 %v754_v8, 0.0  ;;  %v717_v14 = vmul.f32 %v3310_v35, %v583_v12 }
 0x101   : > { %v757_v15 = vadd.f32 %v3315_v37, %v718_v11 }
 0x102   : > { %v2976_v16 = vpack.c.bf16 %v787_v10, %v786_v13  ;;  %v756_v17 = vadd.f32 %v3315_v37, %v717_v14  ;;  %v2727_v18 = vpop.f32.mrb[10].mxu0 }
 0x103   : > { %2776 = vmatmul.mubr.msk.f32.vlgmr.msra.gmra.mrb[4].mxu1 %vm819_vm3, %v3335_v59  ;;  %v789_v19 = vmax.f32 %v757_v15, 0.0  ;;  %v720_v20 = vmul.f32 %v2727_v18, %v3310_v35  ;;  %v593_v21 = vpop.f32.mrb[11].mxu0 }
 0x104   : > { %2974 = vmatpush3.bf16.msra.mxu1 %v2973_v7  ;;  %2778 = vmatprep.mubr.msk.f32.mxu1 %vm3123_vm2, %v3124_v34  ;;  %v788_v22 = vmax.f32 %v756_v17, 0.0  ;;  %v719_v23 = vmul.f32 %v3310_v35, %v593_v21 }
 0x105   : > { %2975 = vmatprep.subr.bf16.mxu1 %v3122_v33  ;;  %v759_v24 = vadd.f32 %v3315_v37, %v720_v20 }
 0x106   : > { %v3375_v25 = vpack.c.bf16 %v789_v19, %v788_v22  ;;  %v758_v26 = vadd.f32 %v3315_v37, %v719_v23  ;;  %v2730_v27 = vpop.f32.mrb[12].mxu0 }
 0x107   : > { %2779 = vmatmul.mubr.msk.f32.gmra.mrb[6].mxu1 %vm819_vm3, %v3329_v57  ;;  %v791_v28 = vmax.f32 %v759_v24, 0.0  ;;  %v722_v29 = vmul.f32 %v2730_v27, %v3310_v35  ;;  %v603_v30 = vpop.f32.mrb[13].mxu0 }
 0x108   : > { %2781 = vmatprep.mubr.msk.f32.mxu1 %vm3123_vm2, %v3124_v34  ;;  %v790_v31 = vmax.f32 %v758_v26, 0.0  ;;  %v721_v32 = vmul.f32 %v3310_v35, %v603_v30 }
 0x109   : > { %v761_v36 = vadd.f32 %v3315_v37, %v722_v29 }
 0x10a   : > { %v3385_v38 = vpack.c.bf16 %v791_v28, %v790_v31  ;;  %v760_v39 = vadd.f32 %v3315_v37, %v721_v32  ;;  %v2733_v40 = vpop.f32.mrb[14].mxu0 }
 0x10b   : > { %2782 = vmatmul.mubr.msk.f32.gmra.mrb[8].mxu1 %vm819_vm3, %v3351_v4  ;;  %v793_v41 = vmax.f32 %v761_v36, 0.0  ;;  %v724_v42 = vmul.f32 %v2733_v40, %v3310_v35  ;;  %v613_v43 = vpop.f32.mrb[15].mxu0 }
 0x10c   : > { %2788 = vmatprep.mubr.msk.f32.mxu1 %vm3123_vm2, %v3124_v34  ;;  %v792_v44 = vmax.f32 %v760_v39, 0.0  ;;  %v723_v45 = vmul.f32 %v3310_v35, %v613_v43 }
 0x10d   : > { %v763_v46 = vadd.f32 %v3315_v37, %v724_v42 }
 0x10e   : > { %v2985_v47 = vpack.c.bf16 %v793_v41, %v792_v44  ;;  %v762_v48 = vadd.f32 %v3315_v37, %v723_v45  ;;  %v2736_v49 = vpop.f32.mrb[16].mxu0 }
 0x10f   : > { %2789 = vmatmul.mubr.msk.f32.vlgmr.msra.gmra.mrb[10].mxu1 %vm819_vm3, %v3335_v59  ;;  %v795_v50 = vmax.f32 %v763_v46, 0.0  ;;  %v726_v51 = vmul.f32 %v2736_v49, %v3310_v35  ;;  %v623_v52 = vpop.f32.mrb[17].mxu0 }
 0x110   : > { %2977 = vmatpush3.bf16.msra.mxu1 %v2976_v16  ;;  %2791 = vmatprep.mubr.msk.f32.mxu1 %vm3123_vm2, %v3124_v34  ;;  %v794_v53 = vmax.f32 %v762_v48, 0.0  ;;  %v725_v54 = vmul.f32 %v3310_v35, %v623_v52 }
 0x111   : > { %2978 = vmatprep.subr.bf16.mxu1 %v3122_v33  ;;  %v765_v55 = vadd.f32 %v3315_v37, %v726_v51  ;;  %2986 = vmatpush3.bf16.msra.mxu0 %v2985_v47 }
 0x112   : > { %v3404_v56 = vpack.c.bf16 %v795_v50, %v794_v53  ;;  %v764_v58 = vadd.f32 %v3315_v37, %v725_v54  ;;  %v2739_v60 = vpop.f32.mrb[18].mxu0  ;;  %2990 = vmatprep.subr.bf16.mxu0 %v3122_v33 }
 0x113   : > { %2792 = vmatmul.mubr.msk.f32.gmra.mrb[12].mxu1 %vm819_vm3, %v3329_v57  ;;  %v797_v61 = vmax.f32 %v765_v55, 0.0  ;;  %v728_v62 = vmul.f32 %v2739_v60, %v3310_v35  ;;  %v633_v63 = vpop.f32.mrb[19].mxu0 }
 0x114   : > { %2794 = vmatprep.mubr.msk.f32.mxu1 %vm3123_vm2, %v3124_v34  ;;  %v796_v0 = vmax.f32 %v764_v58, 0.0  ;;  %v727_v1 = vmul.f32 %v3310_v35, %v633_v63  ;;  %2841 = vmatmul.mubr.msk.f32.vlgmr.msra.gmra.mrb[34].mxu0 %vm819_vm3, %v3335_v59 }
 0x115   : > { %v767_v2 = vadd.f32 %v3315_v37, %v728_v62  ;;  %2843 = vmatprep.mubr.msk.f32.mxu0 %vm3123_vm2, %v3124_v34 }
 0x116   : > { %v2991_v3 = vpack.c.bf16 %v797_v61, %v796_v0  ;;  %v766_v5 = vadd.f32 %v3315_v37, %v727_v1  ;;  %v2742_v6 = vpop.f32.mrb[20].mxu0 }
 0x117   : > { %2795 = vmatmul.mubr.msk.f32.gmra.mrb[14].mxu1 %vm819_vm3, %v3351_v4  ;;  %v799_v7 = vmax.f32 %v767_v2, 0.0  ;;  %v730_v8 = vmul.f32 %v2742_v6, %v3310_v35  ;;  %v643_v9 = vpop.f32.mrb[21].mxu0 }
 0x118   : > { %2801 = vmatprep.mubr.msk.f32.mxu1 %vm3123_vm2, %v3124_v34  ;;  %v798_v10 = vmax.f32 %v766_v5, 0.0  ;;  %2992 = vmatpush3.bf16.msra.mxu0 %v2991_v3  ;;  %v729_v11 = vmul.f32 %v3310_v35, %v643_v9 }
 0x119   : > { %v769_v12 = vadd.f32 %v3315_v37, %v730_v8  ;;  %2844 = vmatmul.mubr.msk.f32.gmra.mrb[36].mxu0 %vm819_vm3, %v3329_v57  ;;  %2996 = vmatprep.subr.bf16.mxu0 %v3122_v33 }
 0x11a   : > { %v3430_v13 = vpack.c.bf16 %v799_v7, %v798_v10  ;;  %v768_v14 = vadd.f32 %v3315_v37, %v729_v11  ;;  %2846 = vmatprep.mubr.msk.f32.mxu0 %vm3123_vm2, %v3124_v34  ;;  %v2745_v15 = vpop.f32.mrb[22].mxu0 }
 0x11b   : > { %2802 = vmatmul.mubr.msk.f32.vlgmr.msra.gmra.mrb[16].mxu1 %vm819_vm3, %v3335_v59  ;;  %v801_v16 = vmax.f32 %v769_v12, 0.0  ;;  %v732_v17 = vmul.f32 %v2745_v15, %v3310_v35  ;;  %v653_v18 = vpop.f32.mrb[23].mxu0 }
 0x11c   : > { %2980 = vmatpush3.bf16.msra.mxu1 %v3375_v25  ;;  %2804 = vmatprep.mubr.msk.f32.mxu1 %vm3123_vm2, %v3124_v34  ;;  %v800_v19 = vmax.f32 %v768_v14, 0.0  ;;  %v731_v20 = vmul.f32 %v3310_v35, %v653_v18 }
 0x11d   : > { %2981 = vmatprep.subr.bf16.mxu1 %v3122_v33  ;;  %2847 = vmatmul.mubr.msk.f32.gmra.mrb[38].mxu0 %vm819_vm3, %v3351_v4  ;;  %v771_v21 = vadd.f32 %v3315_v37, %v732_v17 }
 0x11e   : > { %v2997_v22 = vpack.c.bf16 %v801_v16, %v800_v19  ;;  %v770_v23 = vadd.f32 %v3315_v37, %v731_v20  ;;  %2866 = vmatprep.mubr.msk.f32.mxu0 %vm3123_vm2, %v3124_v34  ;;  %v2748_v24 = vpop.f32.mrb[24].mxu0 }
 0x11f   : > { %2805 = vmatmul.mubr.msk.f32.gmra.mrb[18].mxu1 %vm819_vm3, %v3329_v57  ;;  %v803_v25 = vmax.f32 %v771_v21, 0.0  ;;  %v734_v26 = vmul.f32 %v2748_v24, %v3310_v35  ;;  %v663_v27 = vpop.f32.mrb[25].mxu0 }
 0x120   : > { %2807 = vmatprep.mubr.msk.f32.mxu1 %vm3123_vm2, %v3124_v34  ;;  %v802_v28 = vmax.f32 %v770_v23, 0.0  ;;  %v733_v29 = vmul.f32 %v3310_v35, %v663_v27 }
 0x121   : > { %2867 = vmatmul.mubr.msk.f32.vlgmr.msra.gmra.mrb[40].mxu0 %vm819_vm3, %v3335_v59  ;;  %v773_v30 = vadd.f32 %v3315_v37, %v734_v26 }
 0x122   : > { %v3458_v31 = vpack.c.bf16 %v803_v25, %v802_v28  ;;  %2998 = vmatpush3.bf16.msra.mxu0 %v2997_v22  ;;  %2869 = vmatprep.mubr.msk.f32.mxu0 %vm3123_vm2, %v3124_v34  ;;  %v772_v32 = vadd.f32 %v3315_v37, %v733_v29  ;;  %v2751_v36 = vpop.f32.mrb[26].mxu0 }
 0x123   : > { %2808 = vmatmul.mubr.msk.f32.gmra.mrb[20].mxu1 %vm819_vm3, %v3351_v4  ;;  %v805_v39 = vmax.f32 %v773_v30, 0.0  ;;  %v736_v40 = vmul.f32 %v2751_v36, %v3310_v35  ;;  %v673_v41 = vpop.f32.mrb[27].mxu0  ;;  %3002 = vmatprep.subr.bf16.mxu0 %v3122_v33 }
 0x124   : > { %2814 = vmatprep.mubr.msk.f32.mxu1 %vm3123_vm2, %v3124_v34  ;;  %v804_v42 = vmax.f32 %v772_v32, 0.0  ;;  %v735_v43 = vmul.f32 %v3310_v35, %v673_v41 }
 0x125   : > { %2870 = vmatmul.mubr.msk.f32.gmra.mrb[42].mxu0 %vm819_vm3, %v3329_v57  ;;  %v775_v44 = vadd.f32 %v3315_v37, %v736_v40 }
 0x126   : > { %v3003_v45 = vpack.c.bf16 %v805_v39, %v804_v42  ;;  %2872 = vmatprep.mubr.msk.f32.mxu0 %vm3123_vm2, %v3124_v34  ;;  %v774_v46 = vadd.f32 %v3315_v37, %v735_v43  ;;  %v2754_v47 = vpop.f32.mrb[28].mxu0  ;;  %v3646_v43 = vld [vmem:[%s3866_s5 + $0x8] ss:$0 sm:$0xff] }
 0x127   : > { %2815 = vmatmul.mubr.msk.f32.vlgmr.msra.gmra.mrb[22].mxu1 %vm819_vm3, %v3335_v59  ;;  %v807_v48 = vmax.f32 %v775_v44, 0.0  ;;  %v738_v49 = vmul.f32 %v2754_v47, %v3310_v35  ;;  %v683_v50 = vpop.f32.mrb[29].mxu0 }
 0x128   : > { %2983 = vmatpush3.bf16.msra.mxu1 %v3385_v38  ;;  %2817 = vmatprep.mubr.msk.f32.mxu1 %vm3123_vm2, %v3124_v34  ;;  %v806_v51 = vmax.f32 %v774_v46, 0.0  ;;  %v737_v52 = vmul.f32 %v3310_v35, %v683_v50  ;;  %v3653_v50 = vld [vmem:[%s3867_s6] ss:$0 sm:$0xff] }
 0x129   : > { %2987 = vmatprep.subr.bf16.mxu1 %v3122_v33  ;;  %2873 = vmatmul.mubr.msk.f32.gmra.mrb[44].mxu0 %vm819_vm3, %v3351_v4  ;;  %v777_v53 = vadd.f32 %v3315_v37, %v738_v49 }
 0x12a   : > { %v3487_v54 = vpack.c.bf16 %v807_v48, %v806_v51  ;;  %2892 = vmatprep.mubr.msk.f32.mxu0 %vm3123_vm2, %v3124_v34  ;;  %v776_v38 = vadd.f32 %v3315_v37, %v737_v52  ;;  %v2757_v55 = vpop.f32.mrb[30].mxu0 }
 0x12b   : > { %2818 = vmatmul.mubr.msk.f32.gmra.mrb[24].mxu1 %vm819_vm3, %v3329_v57  ;;  %v809_v58 = vmax.f32 %v777_v53, 0.0  ;;  %v740_v60 = vmul.f32 %v2757_v55, %v3310_v35  ;;  %v693_v61 = vpop.f32.mrb[31].mxu0  ;;  %v3658_v53 = vld [vmem:[%s3868_s7] ss:$0 sm:$0xff] }
 0x12c   : > { %2820 = vmatprep.mubr.msk.f32.mxu1 %vm3123_vm2, %v3124_v34  ;;  %v808_v62 = vmax.f32 %v776_v38, 0.0  ;;  %v739_v63 = vmul.f32 %v3310_v35, %v693_v61 }
 0x12d   : > { %2893 = vmatmul.mubr.msk.f32.vlgmr.msra.gmra.mrb[46].mxu0 %vm819_vm3, %v3335_v59  ;;  %v779_v0 = vadd.f32 %v3315_v37, %v740_v60 }
 0x12e   : > { %3004 = vmatpush3.bf16.msra.mxu0 %v3003_v45  ;;  %2895 = vmatprep.mubr.msk.f32.mxu0 %vm3123_vm2, %v3124_v34  ;;  %v3009_v1 = vpack.c.bf16 %v809_v58, %v808_v62  ;;  %v778_v2 = vadd.f32 %v3315_v37, %v739_v63 }
 0x12f   : > { %2821 = vmatmul.mubr.msk.f32.gmra.mrb[26].mxu1 %vm819_vm3, %v3351_v4  ;;  %v811_v3 = vmax.f32 %v779_v0, 0.0  ;;  %3008 = vmatprep.subr.bf16.mxu0 %v3122_v33 }
 0x130   : > { %2827 = vmatprep.mubr.msk.f32.mxu1 %vm3123_vm2, %v3124_v34  ;;  %v810_v35 = vmax.f32 %v778_v2, 0.0 }
 0x131   : > { %2896 = vmatmul.mubr.msk.f32.gmra.mrb[48].mxu0 %vm819_vm3, %v3329_v57 }
 0x132   : > { %2898 = vmatprep.mubr.msk.f32.mxu0 %vm3123_vm2, %v3124_v34  ;;  %v3012_v5 = vpack.c.bf16 %v811_v3, %v810_v35 }
 0x133   : > { %2828 = vmatmul.mubr.msk.f32.vlgmr.msra.gmra.mrb[28].mxu1 %vm819_vm3, %v3335_v59 }
 0x134   : > { %2989 = vmatpush3.bf16.msra.mxu1 %v3404_v56  ;;  %2830 = vmatprep.mubr.msk.f32.mxu1 %vm3123_vm2, %v3124_v34 }
 0x135   : > { %2993 = vmatprep.subr.bf16.mxu1 %v3122_v33  ;;  %2899 = vmatmul.mubr.msk.f32.gmra.mrb[50].mxu0 %vm819_vm3, %v3351_v4 }
 0x136   : > { %2918 = vmatprep.mubr.msk.f32.mxu0 %vm3123_vm2, %v3124_v34 }
 0x137   : > { %2831 = vmatmul.mubr.msk.f32.gmra.mrb[30].mxu1 %vm819_vm3, %v3329_v57 }
 0x138   : > { %2833 = vmatprep.mubr.msk.f32.mxu1 %vm3123_vm2, %v3124_v34 }
 0x139   : > { %2919 = vmatmul.mubr.msk.f32.vlgmr.msra.gmra.mrb[52].mxu0 %vm819_vm3, %v3335_v59 }
 0x13a   : > { %3010 = vmatpush3.bf16.msra.mxu0 %v3009_v1  ;;  %2921 = vmatprep.mubr.msk.f32.mxu0 %vm3123_vm2, %v3124_v34 }
 0x13b   : > { %2834 = vmatmul.mubr.msk.f32.gmra.mrb[32].mxu1 %vm819_vm3, %v3351_v4 }
 0x13c   : > { %2853 = vmatprep.mubr.msk.f32.mxu1 %vm3123_vm2, %v3124_v34 }
 0x13d   : > { %2922 = vmatmul.mubr.msk.f32.gmra.mrb[54].mxu0 %vm819_vm3, %v3329_v57 }
 0x13e   : > { %2924 = vmatprep.mubr.msk.f32.mxu0 %vm3123_vm2, %v3124_v34 }
 0x13f   : > { %2854 = vmatmul.mubr.msk.f32.vlgmr.msra.gmra.mrb[34].mxu1 %vm819_vm3, %v3335_v59 }
 0x140   : > { %2995 = vmatpush3.bf16.msra.mxu1 %v3430_v13  ;;  %2856 = vmatprep.mubr.msk.f32.mxu1 %vm3123_vm2, %v3124_v34 }
 0x141   : > { %2999 = vmatprep.subr.bf16.mxu1 %v3122_v33  ;;  %2925 = vmatmul.mubr.msk.f32.gmra.mrb[56].mxu0 %vm819_vm3, %v3351_v4 }
 0x142   : > { %2944 = vmatprep.mubr.msk.f32.mxu0 %vm3123_vm2, %v3124_v34 }
 0x143   : > { %2857 = vmatmul.mubr.msk.f32.gmra.mrb[36].mxu1 %vm819_vm3, %v3329_v57 }
 0x144   : > { %2859 = vmatprep.mubr.msk.f32.mxu1 %vm3123_vm2, %v3124_v34 }
 0x145   : > { %2945 = vmatmul.mubr.msk.f32.vlgmr.msra.gmra.mrb[58].mxu0 %vm819_vm3, %v3335_v59 }
 0x146   : > { %2947 = vmatprep.mubr.msk.f32.mxu0 %vm3123_vm2, %v3124_v34 }
 0x147   : > { %2860 = vmatmul.mubr.msk.f32.gmra.mrb[38].mxu1 %vm819_vm3, %v3351_v4 }
 0x148   : > { %2879 = vmatprep.mubr.msk.f32.mxu1 %vm3123_vm2, %v3124_v34 }
 0x149   : > { %2948 = vmatmul.mubr.msk.f32.gmra.mrb[60].mxu0 %vm819_vm3, %v3329_v57 }
 0x14a   : > { %2950 = vmatprep.mubr.msk.f32.mxu0 %vm3123_vm2, %v3124_v34 }
 0x14b   : > { %2880 = vmatmul.mubr.msk.f32.vlgmr.msra.gmra.mrb[40].mxu1 %vm819_vm3, %v3335_v59 }
 0x14c   : > { %3001 = vmatpush3.bf16.msra.mxu1 %v3458_v31  ;;  %2882 = vmatprep.mubr.msk.f32.mxu1 %vm3123_vm2, %v3124_v34 }
 0x14d   : > { %3005 = vmatprep.subr.bf16.mxu1 %v3122_v33  ;;  %2951 = vmatmul.mubr.msk.f32.gmra.mrb[62].mxu0 %vm819_vm3, %v3351_v4 }
 0x14f   : > { %2883 = vmatmul.mubr.msk.f32.gmra.mrb[42].mxu1 %vm819_vm3, %v3329_v57 }
 0x150   : > { %2885 = vmatprep.mubr.msk.f32.mxu1 %vm3123_vm2, %v3124_v34 }
 0x153   : > { %2886 = vmatmul.mubr.msk.f32.gmra.mrb[44].mxu1 %vm819_vm3, %v3351_v4 }
 0x154   : > { %2905 = vmatprep.mubr.msk.f32.mxu1 %vm3123_vm2, %v3124_v34 }
 0x157   : > { %2906 = vmatmul.mubr.msk.f32.vlgmr.msra.gmra.mrb[46].mxu1 %vm819_vm3, %v3335_v59 }
 0x158   : > { %3007 = vmatpush3.bf16.msra.mxu1 %v3487_v54  ;;  %2908 = vmatprep.mubr.msk.f32.mxu1 %vm3123_vm2, %v3124_v34 }
 0x159   : > { %3011 = vmatprep.subr.bf16.mxu1 %v3122_v33  ;;  %v909_v33 = vlaneseq }
 0x15b   : > { %2909 = vmatmul.mubr.msk.f32.gmra.mrb[48].mxu1 %vm819_vm3, %v3329_v57  ;;  %v910_v37 = vshrl.u32 %v909_v33, 7 }
 0x15c   : > { %2911 = vmatprep.mubr.msk.f32.mxu1 %vm3123_vm2, %v3124_v34 }
 0x15d   : > { %v917_v56 = vsub.s32 4, %v910_v37  ;;  %v911_v6 = vsub.s32 3, %v910_v37  ;;  %v923_v9 = vsub.s32 5, %v910_v37  ;;  %v1009_v13 = vsub.s32 6, %v910_v37 }
 0x15e   : > { %v1052_v17 = vsub.s32 0, %v910_v37  ;;  %v1015_v21 = vsub.s32 7, %v910_v37  ;;  %v1058_v22 = vsub.s32 1, %v910_v37  ;;  %v1064_v30 = vsub.s32 2, %v910_v37 }
 0x15f   : > { %2912 = vmatmul.mubr.msk.f32.gmra.mrb[50].mxu1 %vm819_vm3, %v3351_v4 }
 0x160   : > { %2931 = vmatprep.mubr.msk.f32.mxu1 %vm3123_vm2, %v3124_v34 }
 0x163   : > { %2932 = vmatmul.mubr.msk.f32.vlgmr.msra.gmra.mrb[52].mxu1 %vm819_vm3, %v3335_v59 }
 0x164   : > { %3013 = vmatpush3.bf16.msra.mxu1 %v3012_v5  ;;  %2934 = vmatprep.mubr.msk.f32.mxu1 %vm3123_vm2, %v3124_v34 }
 0x167   : > { %2935 = vmatmul.mubr.msk.f32.gmra.mrb[54].mxu1 %vm819_vm3, %v3329_v57 }
 0x168   : > { %2937 = vmatprep.mubr.msk.f32.mxu1 %vm3123_vm2, %v3124_v34 }
 0x16b   : > { %2938 = vmatmul.mubr.msk.f32.gmra.mrb[56].mxu1 %vm819_vm3, %v3351_v4 }
 0x16c   : > { %2957 = vmatprep.mubr.msk.f32.mxu1 %vm3123_vm2, %v3124_v34 }
 0x16f   : > { %2958 = vmatmul.mubr.msk.f32.vlgmr.msra.gmra.mrb[58].mxu1 %vm819_vm3, %v3335_v59  ;;  %v815_v59 = vld [vmem:[%s3866_s5] sm:$0xff] }
 0x170   : > { %2960 = vmatprep.mubr.msk.f32.mxu1 %vm3123_vm2, %v3124_v34  ;;  %v3620_v7 = vrot.slane %v815_v59, %v917_v56  ;;  %v3622_v8 = vrot.slane %v815_v59, %v911_v6  ;;  %v3626_v12 = vrot.slane %v815_v59, %v923_v9  ;;  %v3629_v20 = vrot.slane %v815_v59, %v1009_v13 }
 0x171   : > { %v3631_v25 = vrot.slane %v815_v59, %v1052_v17  ;;  %v3634_v28 = vrot.slane %v815_v59, %v1015_v21  ;;  %v3636_v29 = vrot.slane %v815_v59, %v1058_v22  ;;  %v3641_v42 = vrot.slane %v815_v59, %v1064_v30 }
 0x173   : > { %2961 = vmatmul.mubr.msk.f32.gmra.mrb[60].mxu1 %vm819_vm3, %v3329_v57 }
 0x174   : > { %2963 = vmatprep.mubr.msk.f32.mxu1 %vm3123_vm2, %v3124_v34 }
 0x177   : > { %2964 = vmatmul.mubr.msk.f32.gmra.mrb[62].mxu1 %vm819_vm3, %v3351_v4 }
 0x1ce   : > { %v900_v57 = vpop.f32.mrb[0].mxu1  ;;  %v895_v10 = vpop.f32.mrb[32].mxu0 }
 0x1cf   : > { %v919_v34 = vmul.f32 %v3620_v7, %v900_v57  ;;  %v913_v11 = vmul.f32 %v3622_v8, %v895_v10  ;;  %v2767_v4 = vpop.f32.mrb[1].mxu1  ;;  %v2764_v14 = vpop.f32.mrb[33].mxu0 }
 0x1d1   : > { %v920_v15 = vadd.f32 %v919_v34, %v913_v11 }
 0x1d2   : > { %v905_v16 = vpop.f32.mrb[2].mxu1 }
 0x1d3   : > { %v925_v18 = vmul.f32 %v3626_v12, %v905_v16  ;;  %v2770_v19 = vpop.f32.mrb[3].mxu1 }
 0x1d5   : > { %v926_v23 = vadd.f32 %v925_v18, %v920_v15 }
 0x1d6   : > { %v993_v24 = vpop.f32.mrb[4].mxu1 }
 0x1d7   : > { %v1011_v26 = vmul.f32 %v3629_v20, %v993_v24  ;;  %v2777_v27 = vpop.f32.mrb[5].mxu1  ;;  %v1054_v36 = vmul.f32 %v3631_v25, %v993_v24 }
 0x1d9   : > { %v1012_v31 = vadd.f32 %v1011_v26, %v926_v23 }
 0x1da   : > { %v998_v32 = vpop.f32.mrb[6].mxu1 }
 0x1db   : > { %v1017_v39 = vmul.f32 %v3634_v28, %v998_v32  ;;  %v1060_v40 = vmul.f32 %v3636_v29, %v998_v32  ;;  %v2780_v41 = vpop.f32.mrb[7].mxu1 }
 0x1dd   : > { %v1018_v44 = vadd.f32 %v1017_v39, %v1012_v31  ;;  %v1061_v45 = vadd.f32 %v1060_v40, %v1054_v36 }
 0x1de   : > { %v1003_v46 = vpop.f32.mrb[8].mxu1 }
 0x1df   : > { %v1023_v47 = vmul.f32 %v3646_v43, %v1003_v46  ;;  %v1066_v48 = vmul.f32 %v3641_v42, %v1003_v46  ;;  %v2783_v49 = vpop.f32.mrb[9].mxu1 }
 0x1e1   : > { %v1024_v51 = vadd.f32 %v1023_v47, %v1018_v44  ;;  %v1067_v52 = vadd.f32 %v1066_v48, %v1061_v45 }
 0x1e2   : > { %v1134_v54 = vpop.f32.mrb[10].mxu1 }
 0x1e3   : > { %v1031_v38 = vmul.f32 %v3653_v50, %v1024_v51  ;;  %v1148_v55 = vmul.f32 %v1134_v54, %v3622_v8  ;;  %v2790_v58 = vpop.f32.mrb[11].mxu1 }
 0x1e5   : > { %v1038_v60 = vadd.f32 %v3658_v53, %v1031_v38  ;;  %v1149_v61 = vadd.f32 %v1148_v55, %v1067_v52 }
 0x1e6   : > { %v1139_v62 = vpop.f32.mrb[12].mxu1 }
 0x1e7   : > { %v1039_v63 = vmax.f32 %v1038_v60, 0.0  ;;  %v1150_v0 = vmul.f32 %v1139_v62, %v3620_v7  ;;  %v2793_v1 = vpop.f32.mrb[13].mxu1  ;;  %v3670_v2 = vpop.f32.mrb[34].mxu0 }
 0x1e8   : > { %v2842_v3 = vpop.f32.mrb[35].mxu0 }
 0x1e9   : > { %1041 = vst.msk [vmem:[%s3667_s27] sm:$0xff] %vm1040_vm4, %v1039_v63  ;;  %v1151_v35 = vadd.f32 %v1150_v0, %v1149_v61  ;;  %v1042_v19 = vsel %vm1040_vm4, %v1039_v63, 0.0 }
 0x1ea   : > { %v1144_v5 = vpop.f32.mrb[14].mxu1  ;;  %v1043_v31 = vrot.slane %v1042_v19, 4 }
 0x1eb   : > { %v1152_v33 = vmul.f32 %v1144_v5, %v3626_v12  ;;  %v2796_v37 = vpop.f32.mrb[15].mxu1 }
 0x1ec   : > { %v3675_v56 = vpop.f32.mrb[36].mxu0  ;;  %v1044_v47 = vadd.f32 %v1043_v31, %v1042_v19 }
 0x1ed   : > { %v1153_v6 = vadd.f32 %v1152_v33, %v1151_v35  ;;  %v2845_v59 = vpop.f32.mrb[37].mxu0 }
 0x1ee   : > { %v1220_v9 = vpop.f32.mrb[16].mxu1  ;;  %v1045_v60 = vrot.slane %v1044_v47, 2 }
 0x1ef   : > { %v1234_v57 = vmul.f32 %v1220_v9, %v3629_v20  ;;  %v2803_v10 = vpop.f32.mrb[17].mxu1  ;;  %v1252_v14 = vmul.f32 %v1220_v9, %v3631_v25 }
 0x1f0   : > { %v3678_v34 = vpop.f32.mrb[38].mxu0  ;;  %v1046_v33 = vadd.f32 %v1045_v60, %v1044_v47 }
 0x1f1   : > { %v1235_v11 = vadd.f32 %v1234_v57, %v1153_v6  ;;  %v2848_v4 = vpop.f32.mrb[39].mxu0 }
 0x1f2   : > { %v1225_v13 = vpop.f32.mrb[18].mxu1 }
 0x1f3   : > { %v1236_v15 = vmul.f32 %v1225_v13, %v3634_v28  ;;  %v1254_v16 = vmul.f32 %v1225_v13, %v3636_v29  ;;  %v2806_v17 = vpop.f32.mrb[19].mxu1  ;;  %v1047_v13 = vrot.slane %v1046_v33, 1 }
 0x1f4   : > { %v3683_v18 = vpop.f32.mrb[40].mxu0 }
 0x1f5   : > { %v1237_v21 = vadd.f32 %v1236_v15, %v1235_v11  ;;  %v1255_v22 = vadd.f32 %v1254_v16, %v1252_v14  ;;  %v2868_v23 = vpop.f32.mrb[41].mxu0 }
 0x1f6   : > { %v1230_v24 = vpop.f32.mrb[20].mxu1 }
 0x1f7   : > { %v1238_v26 = vmul.f32 %v3646_v43, %v1230_v24  ;;  %v1256_v27 = vmul.f32 %v1230_v24, %v3641_v42  ;;  %v2809_v30 = vpop.f32.mrb[21].mxu1 }
 0x1f8   : > { %v3688_v32 = vpop.f32.mrb[42].mxu0 }
 0x1f9   : > { %v1239_v36 = vadd.f32 %v1238_v26, %v1237_v21  ;;  %v1257_v39 = vadd.f32 %v1256_v27, %v1255_v22  ;;  %v2871_v40 = vpop.f32.mrb[43].mxu0  ;;  %v1048_v27 = vadd.f32 %v1047_v13, %v1046_v33 }
 0x1fa   : > { %v1324_v41 = vpop.f32.mrb[22].mxu1 }
 0x1fb   : > { %v1240_v44 = vmul.f32 %v3653_v50, %v1239_v36  ;;  %v1338_v45 = vmul.f32 %v1324_v41, %v3622_v8  ;;  %v2816_v46 = vpop.f32.mrb[23].mxu1 }
 0x1fc   : > { %v3692_v48 = vpop.f32.mrb[44].mxu0 }
 0x1fd   : > { %v1241_v49 = vadd.f32 %v3658_v53, %v1240_v44  ;;  %v1339_v51 = vadd.f32 %v1338_v45, %v1257_v39  ;;  %v2874_v52 = vpop.f32.mrb[45].mxu0 }
 0x1fe   : > { %v1329_v54 = vpop.f32.mrb[24].mxu1 }
 0x1ff   : > { %v1242_v38 = vmax.f32 %v1241_v49, 0.0  ;;  %v1340_v55 = vmul.f32 %v1329_v54, %v3620_v7  ;;  %v2819_v58 = vpop.f32.mrb[25].mxu1  ;;  %v1528_v54 = vmul.f32 %v3670_v2, %v3622_v8 }
 0x200   : > { %v3696_v61 = vpop.f32.mrb[46].mxu0 }
 0x201   : > { %1243 = vst.msk [vmem:[%s3667_s27 + $0x8] sm:$0xff] %vm1040_vm4, %v1242_v38  ;;  %v1244_v62 = vsel %vm1040_vm4, %v1242_v38, 0.0  ;;  %v1341_v63 = vadd.f32 %v1340_v55, %v1339_v51  ;;  %v2894_v0 = vpop.f32.mrb[47].mxu0 }
 0x202   : > { %v1245_v1 = vrot.slane %v1244_v62, 4  ;;  %v1334_v3 = vpop.f32.mrb[26].mxu1 }
 0x203   : > { %v1342_v35 = vmul.f32 %v1334_v3, %v3626_v12  ;;  %v2822_v5 = vpop.f32.mrb[27].mxu1 }
 0x204   : > { %v1246_v37 = vadd.f32 %v1245_v1, %v1244_v62  ;;  %v3702_v6 = vpop.f32.mrb[48].mxu0  ;;  %v1530_v62 = vmul.f32 %v3675_v56, %v3620_v7 }
 0x205   : > { %v1343_v59 = vadd.f32 %v1342_v35, %v1341_v63  ;;  %v2897_v9 = vpop.f32.mrb[49].mxu0  ;;  %v1532_v63 = vmul.f32 %v3678_v34, %v3626_v12 }
 0x206   : > { %v1247_v57 = vrot.slane %v1246_v37, 2  ;;  %v1410_v10 = vpop.f32.mrb[28].mxu1 }
 0x207   : > { %v1424_v11 = vmul.f32 %v1410_v10, %v3629_v20  ;;  %v2829_v4 = vpop.f32.mrb[29].mxu1  ;;  %v1442_v22 = vmul.f32 %v1410_v10, %v3631_v25 }
 0x208   : > { %v1248_v14 = vadd.f32 %v1247_v57, %v1246_v37  ;;  %v3705_v15 = vpop.f32.mrb[50].mxu0 }
 0x209   : > { %v1425_v16 = vadd.f32 %v1424_v11, %v1343_v59  ;;  %v2900_v17 = vpop.f32.mrb[51].mxu0 }
 0x20a   : > { %v1249_v19 = vrot.slane %v1248_v14, 1  ;;  %v1415_v21 = vpop.f32.mrb[30].mxu1 }
 0x20b   : > { %v1426_v23 = vmul.f32 %v1415_v21, %v3634_v28  ;;  %v1444_v24 = vmul.f32 %v1415_v21, %v3636_v29  ;;  %v2832_v26 = vpop.f32.mrb[31].mxu1 }
 0x20c   : > { %v1250_v30 = vadd.f32 %v1249_v19, %v1248_v14  ;;  %v3710_v31 = vpop.f32.mrb[52].mxu0 }
 0x20d   : > { %v1427_v36 = vadd.f32 %v1426_v23, %v1425_v16  ;;  %v1445_v39 = vadd.f32 %v1444_v24, %v1442_v22  ;;  %v2920_v40 = vpop.f32.mrb[53].mxu0 }
 0x20e   : > { %v3712_v41 = vadd.f32 %v1250_v30, %v1048_v27  ;;  %v1420_v44 = vpop.f32.mrb[32].mxu1 }
 0x20f   : > { %v1428_v45 = vmul.f32 %v3646_v43, %v1420_v44  ;;  %v1446_v46 = vmul.f32 %v1420_v44, %v3641_v42  ;;  %v2835_v47 = vpop.f32.mrb[33].mxu1 }
 0x210   : > { %v3716_v49 = vpop.f32.mrb[54].mxu0  ;;  %v1720_v47 = vmul.f32 %v3688_v32, %v3620_v7 }
 0x211   : > { %v1429_v51 = vadd.f32 %v1428_v45, %v1427_v36  ;;  %v1447_v52 = vadd.f32 %v1446_v46, %v1445_v39  ;;  %v2923_v38 = vpop.f32.mrb[55].mxu0  ;;  %v1718_v36 = vmul.f32 %v3683_v18, %v3622_v8 }
 0x212   : > { %v1600_v55 = vpop.f32.mrb[34].mxu1 }
 0x213   : > { %v1430_v58 = vmul.f32 %v3653_v50, %v1429_v51  ;;  %v1529_v60 = vadd.f32 %v1528_v54, %v1447_v52  ;;  %v2855_v0 = vpop.f32.mrb[35].mxu1  ;;  %v1614_v2 = vmul.f32 %v1600_v55, %v3629_v20  ;;  %v1632_v9 = vmul.f32 %v1600_v55, %v3631_v25 }
 0x214   : > { %v3725_v1 = vpop.f32.mrb[56].mxu0  ;;  %v1722_v51 = vmul.f32 %v3692_v48, %v3626_v12 }
 0x215   : > { %v1431_v3 = vadd.f32 %v3658_v53, %v1430_v58  ;;  %v1531_v35 = vadd.f32 %v1530_v62, %v1529_v60  ;;  %v2926_v5 = vpop.f32.mrb[57].mxu0 }
 0x216   : > { %v1605_v33 = vpop.f32.mrb[36].mxu1 }
 0x217   : > { %v1432_v37 = vmax.f32 %v1431_v3, 0.0  ;;  %v1533_v59 = vadd.f32 %v1532_v63, %v1531_v35  ;;  %v1634_v57 = vmul.f32 %v1605_v33, %v3636_v29  ;;  %v2858_v56 = vpop.f32.mrb[37].mxu1  ;;  %v1616_v4 = vmul.f32 %v1605_v33, %v3634_v28 }
 0x218   : > { %v3731_v10 = vpop.f32.mrb[58].mxu0 }
 0x219   : > { %1433 = vst.msk [vmem:[%s3667_s27 + $0x10] sm:$0xff] %vm1040_vm4, %v1432_v37  ;;  %v1434_v34 = vsel %vm1040_vm4, %v1432_v37, 0.0  ;;  %v1615_v11 = vadd.f32 %v1614_v2, %v1533_v59  ;;  %v1635_v13 = vadd.f32 %v1634_v57, %v1632_v9  ;;  %v2946_v14 = vpop.f32.mrb[59].mxu0 }
 0x21a   : > { %v1435_v16 = vrot.slane %v1434_v34, 4  ;;  %v1610_v17 = vpop.f32.mrb[38].mxu1 }
 0x21b   : > { %v1617_v19 = vadd.f32 %v1616_v4, %v1615_v11  ;;  %v1618_v21 = vmul.f32 %v3646_v43, %v1610_v17  ;;  %v1636_v22 = vmul.f32 %v1610_v17, %v3641_v42  ;;  %v2861_v23 = vpop.f32.mrb[39].mxu1 }
 0x21c   : > { %v1436_v24 = vadd.f32 %v1435_v16, %v1434_v34  ;;  %v3739_v26 = vpop.f32.mrb[60].mxu0 }
 0x21d   : > { %v1619_v27 = vadd.f32 %v1618_v21, %v1617_v19  ;;  %v1637_v30 = vadd.f32 %v1636_v22, %v1635_v13  ;;  %v2949_v39 = vpop.f32.mrb[61].mxu0  ;;  %v1908_v19 = vmul.f32 %v3696_v61, %v3622_v8 }
 0x21e   : > { %v1437_v40 = vrot.slane %v1436_v24, 2  ;;  %v1790_v44 = vpop.f32.mrb[40].mxu1 }
 0x21f   : > { %v1620_v45 = vmul.f32 %v3653_v50, %v1619_v27  ;;  %v1719_v46 = vadd.f32 %v1718_v36, %v1637_v30  ;;  %v2881_v52 = vpop.f32.mrb[41].mxu1  ;;  %v1804_v62 = vmul.f32 %v1790_v44, %v3629_v20  ;;  %v1822_v32 = vmul.f32 %v1790_v44, %v3631_v25 }
 0x220   : > { %v1438_v54 = vadd.f32 %v1437_v40, %v1436_v24  ;;  %v3748_v38 = vpop.f32.mrb[62].mxu0  ;;  %v1912_v27 = vmul.f32 %v3705_v15, %v3626_v12 }
 0x221   : > { %v1621_v55 = vadd.f32 %v3658_v53, %v1620_v45  ;;  %v1721_v18 = vadd.f32 %v1720_v47, %v1719_v46  ;;  %v2952_v58 = vpop.f32.mrb[63].mxu0 }
 0x222   : > { %v1439_v60 = vrot.slane %v1438_v54, 1  ;;  %v1795_v63 = vpop.f32.mrb[42].mxu1 }
 0x223   : > { %v1622_v0 = vmax.f32 %v1621_v55, 0.0  ;;  %v1723_v3 = vadd.f32 %v1722_v51, %v1721_v18  ;;  %v1824_v35 = vmul.f32 %v1795_v63, %v3636_v29  ;;  %v2884_v48 = vpop.f32.mrb[43].mxu1  ;;  %v1806_v37 = vmul.f32 %v1795_v63, %v3634_v28 }
 0x224   : > { %v1440_v5 = vadd.f32 %v1439_v60, %v1438_v54 }
 0x225   : > { %1623 = vst.msk [vmem:[%s3667_s27 + $0x18] sm:$0xff] %vm1040_vm4, %v1622_v0  ;;  %v1624_v2 = vsel %vm1040_vm4, %v1622_v0, 0.0  ;;  %v1805_v33 = vadd.f32 %v1804_v62, %v1723_v3  ;;  %v1825_v59 = vadd.f32 %v1824_v35, %v1822_v32 }
 0x226   : > { %v1441_v9 = vadd.f32 %v1440_v5, %v3712_v41  ;;  %v1625_v57 = vrot.slane %v1624_v2, 4  ;;  %v1800_v56 = vpop.f32.mrb[44].mxu1  ;;  %v1910_v41 = vmul.f32 %v3702_v6, %v3620_v7 }
 0x227   : > { %v1807_v34 = vadd.f32 %v1806_v37, %v1805_v33  ;;  %v1808_v11 = vmul.f32 %v3646_v43, %v1800_v56  ;;  %v1826_v4 = vmul.f32 %v1800_v56, %v3641_v42  ;;  %v2887_v13 = vpop.f32.mrb[45].mxu1  ;;  %v2098_v33 = vmul.f32 %v3710_v31, %v3622_v8 }
 0x228   : > { %v1626_v14 = vadd.f32 %v1625_v57, %v1624_v2 }
 0x229   : > { %v1809_v16 = vadd.f32 %v1808_v11, %v1807_v34  ;;  %v1827_v17 = vadd.f32 %v1826_v4, %v1825_v59  ;;  %v2102_v34 = vmul.f32 %v3725_v1, %v3626_v12 }
 0x22a   : > { %v1627_v21 = vrot.slane %v1626_v14, 2  ;;  %v1980_v22 = vpop.f32.mrb[46].mxu1 }
 0x22b   : > { %v1810_v23 = vmul.f32 %v3653_v50, %v1809_v16  ;;  %v1909_v24 = vadd.f32 %v1908_v19, %v1827_v17  ;;  %v2907_v30 = vpop.f32.mrb[47].mxu1  ;;  %v1994_v61 = vmul.f32 %v1980_v22, %v3629_v20  ;;  %v2012_v51 = vmul.f32 %v1980_v22, %v3631_v25 }
 0x22c   : > { %v1628_v36 = vadd.f32 %v1627_v21, %v1626_v14 }
 0x22d   : > { %v1811_v39 = vadd.f32 %v3658_v53, %v1810_v23  ;;  %v1911_v40 = vadd.f32 %v1910_v41, %v1909_v24 }
 0x22e   : > { %v1629_v44 = vrot.slane %v1628_v36, 1  ;;  %v1985_v45 = vpop.f32.mrb[48].mxu1 }
 0x22f   : > { %v1812_v46 = vmax.f32 %v1811_v39, 0.0  ;;  %v1913_v47 = vadd.f32 %v1912_v27, %v1911_v40  ;;  %v2014_v52 = vmul.f32 %v1985_v45, %v3636_v29  ;;  %v2910_v54 = vpop.f32.mrb[49].mxu1  ;;  %v1996_v18 = vmul.f32 %v1985_v45, %v3634_v28 }
 0x230   : > { %v1630_v6 = vadd.f32 %v1629_v44, %v1628_v36 }
 0x231   : > { %1813 = vst.msk [vmem:[%s3667_s27 + $0x20] sm:$0xff] %vm1040_vm4, %v1812_v46  ;;  %v1814_v15 = vsel %vm1040_vm4, %v1812_v46, 0.0  ;;  %v1995_v55 = vadd.f32 %v1994_v61, %v1913_v47  ;;  %v2015_v58 = vadd.f32 %v2014_v52, %v2012_v51  ;;  %v2288_v51 = vmul.f32 %v3731_v10, %v3622_v8 }
 0x232   : > { %v1815_v60 = vrot.slane %v1814_v15, 4  ;;  %v1990_v62 = vpop.f32.mrb[50].mxu1  ;;  %v1631_v63 = vadd.f32 %v1630_v6, %v1441_v9  ;;  %v2100_v9 = vmul.f32 %v3716_v49, %v3620_v7 }
 0x233   : > { %v1997_v0 = vadd.f32 %v1996_v18, %v1995_v55  ;;  %v1998_v3 = vmul.f32 %v3646_v43, %v1990_v62  ;;  %v2016_v32 = vmul.f32 %v1990_v62, %v3641_v42  ;;  %v2913_v35 = vpop.f32.mrb[51].mxu1  ;;  %v2290_v55 = vmul.f32 %v3739_v26, %v3620_v7 }
 0x234   : > { %v1816_v48 = vadd.f32 %v1815_v60, %v1814_v15  ;;  %v2292_v18 = vmul.f32 %v3748_v38, %v3626_v12 }
 0x235   : > { %v1999_v5 = vadd.f32 %v1998_v3, %v1997_v0  ;;  %v2017_v2 = vadd.f32 %v2016_v32, %v2015_v58 }
 0x236   : > { %v1817_v37 = vrot.slane %v1816_v48, 2  ;;  %v2170_v59 = vpop.f32.mrb[52].mxu1 }
 0x237   : > { %v2000_v57 = vmul.f32 %v3653_v50, %v1999_v5  ;;  %v2099_v56 = vadd.f32 %v2098_v33, %v2017_v2  ;;  %v2933_v11 = vpop.f32.mrb[53].mxu1  ;;  %v2184_v31 = vmul.f32 %v2170_v59, %v3629_v20  ;;  %v2202_v22 = vmul.f32 %v2170_v59, %v3631_v25 }
 0x238   : > { %v1818_v4 = vadd.f32 %v1817_v37, %v1816_v48 }
 0x239   : > { %v2001_v13 = vadd.f32 %v3658_v53, %v2000_v57  ;;  %v2101_v14 = vadd.f32 %v2100_v9, %v2099_v56 }
 0x23a   : > { %v1819_v16 = vrot.slane %v1818_v4, 1  ;;  %v2175_v17 = vpop.f32.mrb[54].mxu1 }
 0x23b   : > { %v2002_v19 = vmax.f32 %v2001_v13, 0.0  ;;  %v2103_v21 = vadd.f32 %v2102_v34, %v2101_v14  ;;  %v2204_v23 = vmul.f32 %v2175_v17, %v3636_v29  ;;  %v2936_v24 = vpop.f32.mrb[55].mxu1  ;;  %v2186_v27 = vmul.f32 %v2175_v17, %v3634_v28 }
 0x23c   : > { %v1820_v49 = vadd.f32 %v1819_v16, %v1818_v4 }
 0x23d   : > { %2003 = vst.msk [vmem:[%s3667_s27 + $0x28] sm:$0xff] %vm1040_vm4, %v2002_v19  ;;  %v2004_v1 = vsel %vm1040_vm4, %v2002_v19, 0.0  ;;  %v2185_v41 = vadd.f32 %v2184_v31, %v2103_v21  ;;  %v2205_v30 = vadd.f32 %v2204_v23, %v2202_v22 }
 0x23e   : > { %v2005_v36 = vrot.slane %v2004_v1, 4  ;;  %v2180_v39 = vpop.f32.mrb[56].mxu1  ;;  %v1821_v40 = vadd.f32 %v1820_v49, %v1631_v63 }
 0x23f   : > { %v2187_v44 = vadd.f32 %v2186_v27, %v2185_v41  ;;  %v2188_v61 = vmul.f32 %v3646_v43, %v2180_v39  ;;  %v2206_v25 = vmul.f32 %v2180_v39, %v3641_v42  ;;  %v2939_v45 = vpop.f32.mrb[57].mxu1 }
 0x240   : > { %v2006_v29 = vadd.f32 %v2005_v36, %v2004_v1 }
 0x241   : > { %v2189_v46 = vadd.f32 %v2188_v61, %v2187_v44  ;;  %v2207_v47 = vadd.f32 %v2206_v25, %v2205_v30 }
 0x242   : > { %v2007_v52 = vrot.slane %v2006_v29, 2  ;;  %v2360_v54 = vpop.f32.mrb[58].mxu1 }
 0x243   : > { %v2190_v6 = vmul.f32 %v3653_v50, %v2189_v46  ;;  %v2289_v15 = vadd.f32 %v2288_v51, %v2207_v47  ;;  %v2959_v42 = vpop.f32.mrb[59].mxu1  ;;  %v2374_v3 = vmul.f32 %v2360_v54, %v3629_v20 }
 0x244   : > { %v2008_v58 = vadd.f32 %v2007_v52, %v2006_v29 }
 0x245   : > { %v2191_v60 = vadd.f32 %v3658_v53, %v2190_v6  ;;  %v2291_v62 = vadd.f32 %v2290_v55, %v2289_v15 }
 0x246   : > { %v2009_v63 = vrot.slane %v2008_v58, 1  ;;  %v2365_v0 = vpop.f32.mrb[60].mxu1 }
 0x247   : > { %v2192_v8 = vmax.f32 %v2191_v60, 0.0  ;;  %v2293_v10 = vadd.f32 %v2292_v18, %v2291_v62  ;;  %v2962_v32 = vpop.f32.mrb[61].mxu1  ;;  %v2376_v12 = vmul.f32 %v2365_v0, %v3634_v28 }
 0x248   : > { %v2010_v35 = vadd.f32 %v2009_v63, %v2008_v58 }
 0x249   : > { %2193 = vst.msk [vmem:[%s3667_s27 + $0x30] sm:$0xff] %vm1040_vm4, %v2192_v8  ;;  %v2194_v7 = vsel %vm1040_vm4, %v2192_v8, 0.0  ;;  %v2375_v26 = vadd.f32 %v2374_v3, %v2293_v10 }
 0x24a   : > { %v2195_v38 = vrot.slane %v2194_v7, 4  ;;  %v2370_v48 = vpop.f32.mrb[62].mxu1  ;;  %v2011_v5 = vadd.f32 %v2010_v35, %v1821_v40 }
 0x24b   : > { %v2377_v2 = vadd.f32 %v2376_v12, %v2375_v26  ;;  %v2378_v33 = vmul.f32 %v3646_v43, %v2370_v48  ;;  %v2965_v37 = vpop.f32.mrb[63].mxu1 }
 0x24c   : > { %v2196_v59 = vadd.f32 %v2195_v38, %v2194_v7 }
 0x24d   : > { %v2379_v20 = vadd.f32 %v2378_v33, %v2377_v2 }
 0x24e   : > { %v2197_v57 = vrot.slane %v2196_v59, 2 }
 0x24f   : > { %v2380_v56 = vmul.f32 %v3653_v50, %v2379_v20 }
 0x250   : > { %v2198_v9 = vadd.f32 %v2197_v57, %v2196_v59 }
 0x251   : > { %v2381_v34 = vadd.f32 %v3658_v53, %v2380_v56 }
 0x252   : > { %v2199_v11 = vrot.slane %v2198_v9, 1 }
 0x253   : > { %v2382_v28 = vmax.f32 %v2381_v34, 0.0 }
 0x254   : > { %v2200_v4 = vadd.f32 %v2199_v11, %v2198_v9 }
 0x255   : > { %2383 = vst.msk [vmem:[%s3667_s27 + $0x38] sm:$0xff] %vm1040_vm4, %v2382_v28  ;;  %v2384_v13 = vsel %vm1040_vm4, %v2382_v28, 0.0 }
 0x256   : > { %v2385_v14 = vrot.slane %v2384_v13, 4  ;;  %v2201_v43 = vadd.f32 %v2200_v4, %v2011_v5 }
 0x258   : > { %v2386_v16 = vadd.f32 %v2385_v14, %v2384_v13 }
 0x25a   : > { %v2387_v31 = vrot.slane %v2386_v16, 2 }
 0x25c   : > { %v2388_v17 = vadd.f32 %v2387_v31, %v2386_v16 }
 0x25e   : > { %v2389_v19 = vrot.slane %v2388_v17, 1 }
 0x260   : > { %v2390_v50 = vadd.f32 %v2389_v19, %v2388_v17 }
 0x262   : > { %v2391_v53 = vadd.f32 %v2390_v50, %v2201_v43 }
 0x264   : > { %v2392_v21 = vmul.f32 0.015625, %v2391_v53 }
 0x266   : > { %2394 = vst.msk [vmem:[%s332_s29] sm:$0x1] %vm2393_vm5, %v2392_v21 }
 0x267   : > { %3071 = shalt.err (!%p3068_p3)
}
 0x268   : > { %s3072_s27 = scalar_lea.hbm %s3819_s21, 16  ;;  %s3076_s29 = scalar_lea.hbm %s3870_s9, 32 }
 0x269   : > { %p3073_p4 = scmp.ne.s32.totalorder %s3819_s21, %s3072_s27  ;;  %p3077_p9 = scmp.lt.u32.totalorder %s3819_s21, %s3870_s9 }
 0x26a   : > { %p3078_p10 = scmp.lt.u32.totalorder %s3076_s29, %s3072_s27  ;;  %p3080_p12 = scmp.lt.u32.totalorder %s3072_s27, %s3819_s21 }
 0x26b   : > { %p3074_p7 = pnand %p3073_p4, %p3214_p5 }
 0x26c   : > { %p3079_p11 = por %p3078_p10, %p3077_p9 }
 0x26d   : > { %p3075_p8 = pneg %p3074_p7 }
 0x26e   : > { %p3081_p13 = por %p3080_p12, %p3079_p11 }
 0x270   : > { %p3082_p0 = pnand %p3081_p13, %p3075_p8 }
 0x272   : > { %3085 = shalt.err (!%p3082_p0)
}
 0x273   : > { %3016 = dma.vmem_to_hbm [thread:$0]  (%p3214_p5), %s3821_s14, 16, %s3819_s21, %s2401_s22  }
 0x274 PF: > { %p3022_p1 = scmp.ge.s32.totalorder %s3120_s12, 2  ;;  %s2436_s24 = sand.u32 1, %s3108_s30  }
 0x275   : > { %s2437_s13 = scalar_lea.sflag [#allocation3], %s2436_s24 }
 0x276   : > { %p3019_p2 = pnand %p3022_p1, %p3218_p6 }
 0x278   : > { %3103 = dma.done.wait (!%p3019_p2), %s2437_s13, 16  }
 0x279   : > { %3105 = vsyncadd (!%p3019_p2), %s2437_s13, 4294967280  ;;  %p20_p3 = scmp.ge.s32.totalorder %s3201_s15, 4   ;;  %s3873_s30 = smov %s3112_s10 }
 0x27a   : > { %s3874_s10 = smov %s3116_s11  ;;  %s3875_s11 = smov %s3212_s18 }
 0x27b   : > { %s3876_s12 = smov %s3201_s15  ;;  %22 = sbr.rel (!%p20_p3) target bundleno = 3 (0x3), region = 99 }
 0x282   :  { %2441 = vsyncpa [#allocation3], 1 }
 0x283   :  { %2443 = vsyncpa [#allocation3 + $0x1], 1 }

</bundles_post_ra>
